<compile_context>
chip_gen: v7x
topology: tpu7x:2x2x1
jax: 0.10.0
libtpu: 0.0.40
codegen_flags: <defaults>
</compile_context>

<pallas_src>
import functools
import math

import jax
import jax.numpy as jnp
from jax.experimental import pallas as pl
from jax.experimental.pallas import tpu as pltpu


def _round_up(x, m):
    return ((x + m - 1) // m) * m


def _pad_to(arr, shape):
    pads = [(0, t - s) for s, t in zip(arr.shape, shape)]
    return jnp.pad(arr, pads)


# ---------------------------------------------------------------------------
# Kernels
# ---------------------------------------------------------------------------
def linear_kernel(x_ref, wt_ref, b_ref, o_ref):
    """o_rows = x_rows @ W^T + b   (bf16 operands, f32 accumulation)."""
    acc = jnp.dot(x_ref[...], wt_ref[...], preferred_element_type=jnp.float32)
    o_ref[...] = (acc + b_ref[...]).astype(o_ref.dtype)


def propagate_relu_linear_kernel(a_ref, h_ref, w2t_ref, b2_ref, o_ref, acc_ref):
    """o_rows = relu(A[row_tile,:] @ lin1) @ W2^T + b2, K-tiled with f32 accumulator."""
    k = pl.program_id(1)

    @pl.when(k == 0)
    def _():
        acc_ref[...] = jnp.zeros_like(acc_ref)

    acc_ref[...] += jnp.dot(a_ref[...], h_ref[...],
                            preferred_element_type=jnp.float32)

    @pl.when(k == pl.num_programs(1) - 1)
    def _():
        h = jnp.maximum(acc_ref[...], 0.0).astype(jnp.bfloat16)
        z = jnp.dot(h, w2t_ref[...], preferred_element_type=jnp.float32)
        o_ref[...] = (z + b2_ref[...]).astype(o_ref.dtype)


def propagate_logsoftmax_kernel(num_classes, a_ref, h_ref, o_ref, acc_ref):
    """o_rows = log_softmax(A[row_tile,:] @ lin2) over the real classes, K-tiled."""
    k = pl.program_id(1)

    @pl.when(k == 0)
    def _():
        acc_ref[...] = jnp.zeros_like(acc_ref)

    acc_ref[...] += jnp.dot(a_ref[...], h_ref[...],
                            preferred_element_type=jnp.float32)

    @pl.when(k == pl.num_programs(1) - 1)
    def _():
        z = acc_ref[...]
        # Only the first `num_classes` lanes are real; pad lanes are exactly zero -> mask.
        col = jax.lax.broadcasted_iota(jnp.int32, z.shape, 1)
        zm = jnp.where(col < num_classes, z, jnp.float32(-1e30))
        m = jnp.max(zm, axis=1, keepdims=True)
        zs = zm - m
        lse = jnp.log(jnp.sum(jnp.exp(zs), axis=1, keepdims=True))
        o_ref[...] = (zs - lse).astype(o_ref.dtype)


# ---------------------------------------------------------------------------
# pallas_call wrappers
# ---------------------------------------------------------------------------
def _compiler_params(block_bytes, dimension_semantics):
    """Generation-aware VMEM limit; never clamps below the kernel's real requirement."""
    need = 2 * int(block_bytes) + (2 << 20)        # double-buffered blocks + slack
    try:
        cap = int(getattr(pltpu.get_tpu_info(), "vmem_capacity_bytes", 64 << 20))
    except Exception:                              # pragma: no cover - defensive
        cap = 64 << 20                             # v7x per-TC lower bound
    limit = min(max(need, 32 << 20), (cap * 3) // 4)   # ~48 MiB on v7x, ~96 MiB on v5e/v6e
    limit = max(limit, need)                           # never below the actual requirement
    return pltpu.CompilerParams(
        dimension_semantics=dimension_semantics,
        vmem_limit_bytes=int(limit),
    )


def _linear(x, wt, b, out_dtype, tm):
    """Row-tiled lin1: reads x once, writes lin1 once (not fused to avoid recompute per A tile)."""
    npad, fin = x.shape
    fout = wt.shape[1]
    out_isz = jnp.dtype(out_dtype).itemsize
    block_bytes = tm * fin * 2 + fin * fout * 2 + fout * 4 + tm * fout * out_isz
    cost = pl.CostEstimate(
        flops=int(2 * npad * fin * fout),
        transcendentals=0,
        bytes_accessed=int(npad * fin * 2 + fin * fout * 2 + fout * 4
                           + npad * fout * out_isz),
    )
    return pl.pallas_call(
        linear_kernel,
        out_shape=jax.ShapeDtypeStruct((npad, fout), out_dtype),
        grid=(npad // tm,),
        in_specs=[
            pl.BlockSpec((tm, fin), lambda i: (i, 0)),
            pl.BlockSpec((fin, fout), lambda i: (0, 0)),
            pl.BlockSpec((1, fout), lambda i: (0, 0)),
        ],
        out_specs=pl.BlockSpec((tm, fout), lambda i: (i, 0)),
        compiler_params=_compiler_params(block_bytes, ("parallel",)),
        cost_estimate=cost,
    )(x, wt, b)


def _propagate_fused(a, lin1, w2t, b2, out_dtype, tm, tk):
    """lin2 = relu(A @ lin1) @ W2^T + b2, K-tiled, second linear fused in the epilogue."""
    npad = a.shape[0]
    hw = lin1.shape[1]
    cw = w2t.shape[1]
    out_isz = jnp.dtype(out_dtype).itemsize
    block_bytes = (tm * tk * 2 + tk * hw * 2 + hw * cw * 2 + cw * 4
                   + tm * cw * out_isz + tm * hw * 4)
    cost = pl.CostEstimate(
        flops=int(2 * npad * npad * hw + 2 * npad * hw * cw),
        transcendentals=0,
        bytes_accessed=int(npad * npad * 2 + npad * hw * 2 + hw * cw * 2 + cw * 4
                           + npad * cw * out_isz),
    )
    return pl.pallas_call(
        propagate_relu_linear_kernel,
        out_shape=jax.ShapeDtypeStruct((npad, cw), out_dtype),
        grid=(npad // tm, npad // tk),
        in_specs=[
            pl.BlockSpec((tm, tk), lambda i, k: (i, k)),     # streamed A tile
            pl.BlockSpec((tk, hw), lambda i, k: (k, 0)),     # lin1 K-slab
            pl.BlockSpec((hw, cw), lambda i, k: (0, 0)),     # resident W2^T (~32 KiB)
            pl.BlockSpec((1, cw), lambda i, k: (0, 0)),      # resident b2
        ],
        out_specs=pl.BlockSpec((tm, cw), lambda i, k: (i, 0)),
        scratch_shapes=[pltpu.VMEM((tm, hw), jnp.float32)],
        compiler_params=_compiler_params(block_bytes, ("parallel", "arbitrary")),
        cost_estimate=cost,
    )(a, lin1, w2t, b2)


def _propagate_logsoftmax(a, lin2, num_classes, out_dtype, tm, tk):
    """out = log_softmax(A @ lin2), K-tiled, masked to the real class lanes."""
    npad = a.shape[0]
    cw = lin2.shape[1]
    out_isz = jnp.dtype(out_dtype).itemsize
    block_bytes = tm * tk * 2 + tk * cw * 2 + tm * cw * out_isz + tm * cw * 4
    cost = pl.CostEstimate(
        flops=int(2 * npad * npad * cw + 6 * npad * cw),
        transcendentals=int(npad * cw + npad),
        bytes_accessed=int(npad * npad * 2 + npad * cw * 2 + npad * cw * out_isz),
    )
    return pl.pallas_call(
        functools.partial(propagate_logsoftmax_kernel, num_classes),
        out_shape=jax.ShapeDtypeStruct((npad, cw), out_dtype),
        grid=(npad // tm, npad // tk),
        in_specs=[
            pl.BlockSpec((tm, tk), lambda i, k: (i, k)),     # streamed A tile
            pl.BlockSpec((tk, cw), lambda i, k: (k, 0)),     # lin2 K-slab
        ],
        out_specs=pl.BlockSpec((tm, cw), lambda i, k: (i, 0)),
        scratch_shapes=[pltpu.VMEM((tm, cw), jnp.float32)],
        compiler_params=_compiler_params(block_bytes, ("parallel", "arbitrary")),
        cost_estimate=cost,
    )(a, lin2)


# ---------------------------------------------------------------------------
# Graph / module glue
# ---------------------------------------------------------------------------
def prepare_adjacency(edge_index, num_nodes, npad, dtype=jnp.bfloat16):
    """Build the normalized dense adjacency ONCE per graph, at padded shape, in bf16.

    Matches the custom GCNConv exactly: add_self_loops; degree over edge_index[0] (source);
    norm = deg^-1/2[src] * deg^-1/2[dst]; out[dst] += norm * x[src]  =>  A[dst, src] = norm.
    """
    loops = jnp.stack([jnp.arange(num_nodes, dtype=edge_index.dtype)] * 2)
    ei = jnp.concatenate([edge_index, loops], axis=1)
    row, col = ei[0], ei[1]                      # row = source, col = target
    deg = jnp.zeros((num_nodes,), jnp.float32).at[row].add(1.0)
    dinv = deg ** -0.5
    norm = dinv[row] * dinv[col]
    a = jnp.zeros((npad, npad), jnp.float32).at[col, row].add(norm)
    return a.astype(dtype)


def gcn_net_forward(a_bf, x, params, *, tm=256, tk=256):
    """Forward pass. `a_bf` is the pre-built padded bf16 adjacency (prepare_adjacency)."""
    n, f = x.shape
    hidden = params["w1"].shape[0]
    ncls = params["w2"].shape[0]

    npad = a_bf.shape[0]
    assert npad % tm == 0 and npad % tk == 0 and npad >= n
    fpad = _round_up(f, 128)             # lane-dense feature dim
    hpad = _round_up(hidden, 128)        # lane-dense hidden dim (16 -> 128)
    cpad = _round_up(ncls, 128)          # lane-dense class dim  (2 -> 128)

    # Small per-step padding/casts (A, the big array, is prepared once outside).
    # bf16 operands + f32 accumulation: expect ~1e-2-level deviation from an f32 reference.
    x_bf = _pad_to(x, (npad, fpad)).astype(jnp.bfloat16)
    w1t = _pad_to(params["w1"].T, (fpad, hpad)).astype(jnp.bfloat16)
    b1 = _pad_to(params["b1"].reshape(1, -1), (1, hpad)).astype(jnp.float32)
    w2t = _pad_to(params["w2"].T, (hpad, cpad)).astype(jnp.bfloat16)
    b2 = _pad_to(params["b2"].reshape(1, -1), (1, cpad)).astype(jnp.float32)

    # conv1 linear (reads x once, writes lin1 once).
    lin1 = _linear(x_bf, w1t, b1, jnp.bfloat16, tm)

    # conv1 propagate + ReLU + conv2 linear, fused: h never round-trips to HBM.
    # TODO(synk): F.dropout(h, training=self.training) — identity in eval mode.
    lin2 = _propagate_fused(a_bf, lin1, w2t, b2, jnp.bfloat16, tm, tk)

    # conv2 propagate + masked log_softmax over the real classes.
    logits = _propagate_logsoftmax(a_bf, lin2, ncls, jnp.float32, tm, tk)
    return logits[:n, :ncls]


def init_params(key, num_features, hidden=16, num_classes=2):
    """Deterministic init mimicking torch.nn.Linear's uniform(-1/sqrt(fan_in), ...)."""
    k1, k2, k3, k4 = jax.random.split(key, 4)
    bnd1 = 1.0 / jnp.sqrt(num_features)
    bnd2 = 1.0 / jnp.sqrt(hidden)
    return {
        "w1": jax.random.uniform(k1, (hidden, num_features), jnp.float32, -bnd1, bnd1),
        "b1": jax.random.uniform(k2, (hidden,), jnp.float32, -bnd1, bnd1),
        "w2": jax.random.uniform(k3, (num_classes, hidden), jnp.float32, -bnd2, bnd2),
        "b2": jax.random.uniform(k4, (num_classes,), jnp.float32, -bnd2, bnd2),
    }


def _reference(x, edge_index, params, n):
    """Pure-JAX f32 reference of the module's forward (for a loose sanity check)."""
    loops = jnp.stack([jnp.arange(n, dtype=edge_index.dtype)] * 2)
    ei = jnp.concatenate([edge_index, loops], axis=1)
    row, col = ei[0], ei[1]
    deg = jnp.zeros((n,), jnp.float32).at[row].add(1.0)
    dinv = deg ** -0.5
    norm = dinv[row] * dinv[col]
    a = jnp.zeros((n, n), jnp.float32).at[col, row].add(norm)
    h = jnp.maximum(a @ (x @ params["w1"].T + params["b1"]), 0.0)
    z = a @ (h @ params["w2"].T + params["b2"])
    return jax.nn.log_softmax(z, axis=1)


if __name__ == "__main__":
    key = jax.random.PRNGKey(0)
    kx, kp = jax.random.split(key, 2)

    N, F_in = 8, 4                                   # 8 nodes, 4 node features
    x = jax.random.normal(kx, (N, F_in), jnp.float32)

    # small deterministic directed edge list (2, E), E = 12
    src = jnp.array([0, 1, 2, 3, 4, 5, 6, 7, 0, 2, 4, 6], dtype=jnp.int32)
    dst = jnp.array([1, 2, 3, 4, 5, 6, 7, 0, 3, 5, 7, 1], dtype=jnp.int32)
    edge_index = jnp.stack([src, dst])

    params = init_params(kp, F_in, hidden=16, num_classes=2)

    TM = TK = 256
    npad = _round_up(max(N, 1), math.lcm(TM, TK))
    # Built once per graph (hoisted out of the forward pass per the perf review).
    a_bf = prepare_adjacency(edge_index, N, npad)

    fwd = jax.jit(functools.partial(gcn_net_forward, tm=TM, tk=TK))
    out = jax.block_until_ready(fwd(a_bf, x, params))

    assert out.shape == (N, 2)
    assert bool(jnp.all(jnp.isfinite(out)))

    ref = _reference(x, edge_index, params, N)
    assert bool(jnp.max(jnp.abs(out - ref)) < 1e-1)   # bf16 operands -> loose tolerance

    print("KERNEL_OK")
</pallas_src>

<mosaic_0001>
module attributes {stable_mosaic.version = 11 : i64} {
  func.func @propagate_relu_linear_kernel(%arg0: i32, %arg1: i32, %arg2: memref<256x256xbf16, #tpu.memory_space<vmem>>, %arg3: memref<256x128xbf16, #tpu.memory_space<vmem>>, %arg4: memref<128x128xbf16, #tpu.memory_space<vmem>>, %arg5: memref<1x128xf32, #tpu.memory_space<vmem>>, %arg6: memref<256x128xbf16, #tpu.memory_space<vmem>>, %arg7: memref<256x128xf32, #tpu.memory_space<vmem>>) attributes {dimension_semantics = [#tpu.dimension_semantics<parallel>, #tpu.dimension_semantics<arbitrary>], iteration_bounds = array<i64: 1, 1>, scalar_prefetch = 0 : i64, scratch_operands = 1 : i64, tpu.core_type = #tpu.core_type<tc>, window_params = [{transform_indices = @transform_0, window_bounds = array<i64: 256, 256>}, {transform_indices = @transform_1, window_bounds = array<i64: 256, 128>}, {pipeline_mode = #tpu.pipeline_mode<synchronous>, transform_indices = @transform_2, window_bounds = array<i64: 128, 128>}, {pipeline_mode = #tpu.pipeline_mode<synchronous>, transform_indices = @transform_3, window_bounds = array<i64: 1, 128>}, {transform_indices = @transform_4, window_bounds = array<i64: 256, 128>}]} {
    %c0_i32 = arith.constant 0 : i32
    %0 = arith.cmpi eq, %arg1, %c0_i32 : i32
    %1 = arith.extui %0 : i1 to i32
    %c0_i32_0 = arith.constant 0 : i32
    %2 = arith.cmpi ne, %1, %c0_i32_0 : i32
    scf.if %2 {
      %cst_10 = arith.constant 0.000000e+00 : f32
      %12 = vector.broadcast %cst_10 : f32 to vector<256x128xf32>
      %c0_11 = arith.constant 0 : index
      %c0_12 = arith.constant 0 : index
      %13 = vector.load %arg7[%c0_11, %c0_12] : memref<256x128xf32, #tpu.memory_space<vmem>>, vector<256x128xf32>
      tpu.vector_store %arg7[%c0_11, %c0_12], %12 {strides = array<i32>} : memref<256x128xf32, #tpu.memory_space<vmem>>, vector<256x128xf32>,
    } else {
    }
    %c0 = arith.constant 0 : index
    %c0_1 = arith.constant 0 : index
    %3 = vector.load %arg7[%c0, %c0_1] : memref<256x128xf32, #tpu.memory_space<vmem>>, vector<256x128xf32>
    %c0_2 = arith.constant 0 : index
    %c0_3 = arith.constant 0 : index
    %4 = vector.load %arg2[%c0_2, %c0_3] : memref<256x256xbf16, #tpu.memory_space<vmem>>, vector<256x256xbf16>
    %c0_4 = arith.constant 0 : index
    %c0_5 = arith.constant 0 : index
    %5 = vector.load %arg3[%c0_4, %c0_5] : memref<256x128xbf16, #tpu.memory_space<vmem>>, vector<256x128xbf16>
    %cst = arith.constant dense<0.000000e+00> : vector<256x128xf32>
    %6 = tpu.matmul %4, %5, %cst {dimension_numbers = #tpu.dot_dimension_numbers<[1], [0], [0], [1], [0, 0, 1, 1], [], []>} : vector<256x256xbf16>, vector<256x128xbf16>, vector<256x128xf32> -> vector<256x128xf32>
    %7 = arith.addf %3, %6 : vector<256x128xf32>
    %c0_6 = arith.constant 0 : index
    %c0_7 = arith.constant 0 : index
    %8 = vector.load %arg7[%c0_6, %c0_7] : memref<256x128xf32, #tpu.memory_space<vmem>>, vector<256x128xf32>
    tpu.vector_store %arg7[%c0_6, %c0_7], %7 {strides = array<i32>} : memref<256x128xf32, #tpu.memory_space<vmem>>, vector<256x128xf32>,
    %c0_i32_8 = arith.constant 0 : i32
    %9 = arith.cmpi eq, %arg1, %c0_i32_8 : i32
    %10 = arith.extui %9 : i1 to i32
    %c0_i32_9 = arith.constant 0 : i32
    %11 = arith.cmpi ne, %10, %c0_i32_9 : i32
    scf.if %11 {
      %c0_10 = arith.constant 0 : index
      %c0_11 = arith.constant 0 : index
      %12 = vector.load %arg7[%c0_10, %c0_11] : memref<256x128xf32, #tpu.memory_space<vmem>>, vector<256x128xf32>
      %cst_12 = arith.constant 0.000000e+00 : f32
      %13 = vector.broadcast %cst_12 : f32 to vector<256x128xf32>
      %14 = arith.maximumf %12, %13 : vector<256x128xf32>
      %15 = arith.truncf %14 : vector<256x128xf32> to vector<256x128xbf16>
      %c0_13 = arith.constant 0 : index
      %c0_14 = arith.constant 0 : index
      %16 = vector.load %arg4[%c0_13, %c0_14] : memref<128x128xbf16, #tpu.memory_space<vmem>>, vector<128x128xbf16>
      %cst_15 = arith.constant dense<0.000000e+00> : vector<256x128xf32>
      %17 = tpu.matmul %15, %16, %cst_15 {dimension_numbers = #tpu.dot_dimension_numbers<[1], [0], [0], [1], [0, 0, 1, 1], [], []>} : vector<256x128xbf16>, vector<128x128xbf16>, vector<256x128xf32> -> vector<256x128xf32>
      %c0_16 = arith.constant 0 : index
      %c0_17 = arith.constant 0 : index
      %18 = vector.load %arg5[%c0_16, %c0_17] : memref<1x128xf32, #tpu.memory_space<vmem>>, vector<1x128xf32>
      %19 = vector.broadcast %18 : vector<1x128xf32> to vector<256x128xf32>
      %20 = arith.addf %17, %19 : vector<256x128xf32>
      %21 = arith.truncf %20 : vector<256x128xf32> to vector<256x128xbf16>
      %c0_18 = arith.constant 0 : index
      %c0_19 = arith.constant 0 : index
      %22 = vector.load %arg6[%c0_18, %c0_19] : memref<256x128xbf16, #tpu.memory_space<vmem>>, vector<256x128xbf16>
      tpu.vector_store %arg6[%c0_18, %c0_19], %21 {strides = array<i32>} : memref<256x128xbf16, #tpu.memory_space<vmem>>, vector<256x128xbf16>,
    } else {
    }
    return
  }
  func.func @transform_0(%arg0: i32, %arg1: i32) -> (i32, i32) {
    %c0_i32 = arith.constant 0 : i32
    return %arg0, %arg1 : i32, i32
  }
  func.func @transform_1(%arg0: i32, %arg1: i32) -> (i32, i32) {
    %c0_i32 = arith.constant 0 : i32
    %c0_i32_0 = arith.constant 0 : i32
    return %arg1, %c0_i32 : i32, i32
  }
  func.func @transform_2(%arg0: i32, %arg1: i32) -> (i32, i32) {
    %c0_i32 = arith.constant 0 : i32
    %c0_i32_0 = arith.constant 0 : i32
    %c0_i32_1 = arith.constant 0 : i32
    return %c0_i32, %c0_i32_0 : i32, i32
  }
  func.func @transform_3(%arg0: i32, %arg1: i32) -> (i32, i32) {
    %c0_i32 = arith.constant 0 : i32
    %c0_i32_0 = arith.constant 0 : i32
    %c0_i32_1 = arith.constant 0 : i32
    return %c0_i32, %c0_i32_0 : i32, i32
  }
  func.func @transform_4(%arg0: i32, %arg1: i32) -> (i32, i32) {
    %c0_i32 = arith.constant 0 : i32
    %c0_i32_0 = arith.constant 0 : i32
    return %arg0, %c0_i32 : i32, i32
  }
}

module attributes {stable_mosaic.version = 11 : i64} {
  func.func @linear_kernel(%arg0: i32, %arg1: memref<256x128xbf16, #tpu.memory_space<vmem>>, %arg2: memref<128x128xbf16, #tpu.memory_space<vmem>>, %arg3: memref<1x128xf32, #tpu.memory_space<vmem>>, %arg4: memref<256x128xbf16, #tpu.memory_space<vmem>>) attributes {dimension_semantics = [#tpu.dimension_semantics<parallel>], iteration_bounds = array<i64: 1>, scalar_prefetch = 0 : i64, scratch_operands = 0 : i64, tpu.core_type = #tpu.core_type<tc>, window_params = [{transform_indices = @transform_0, window_bounds = array<i64: 256, 128>}, {pipeline_mode = #tpu.pipeline_mode<synchronous>, transform_indices = @transform_1, window_bounds = array<i64: 128, 128>}, {pipeline_mode = #tpu.pipeline_mode<synchronous>, transform_indices = @transform_2, window_bounds = array<i64: 1, 128>}, {transform_indices = @transform_3, window_bounds = array<i64: 256, 128>}]} {
    %c0 = arith.constant 0 : index
    %c0_0 = arith.constant 0 : index
    %0 = vector.load %arg1[%c0, %c0_0] : memref<256x128xbf16, #tpu.memory_space<vmem>>, vector<256x128xbf16>
    %c0_1 = arith.constant 0 : index
    %c0_2 = arith.constant 0 : index
    %1 = vector.load %arg2[%c0_1, %c0_2] : memref<128x128xbf16, #tpu.memory_space<vmem>>, vector<128x128xbf16>
    %cst = arith.constant dense<0.000000e+00> : vector<256x128xf32>
    %2 = tpu.matmul %0, %1, %cst {dimension_numbers = #tpu.dot_dimension_numbers<[1], [0], [0], [1], [0, 0, 1, 1], [], []>} : vector<256x128xbf16>, vector<128x128xbf16>, vector<256x128xf32> -> vector<256x128xf32>
    %c0_3 = arith.constant 0 : index
    %c0_4 = arith.constant 0 : index
    %3 = vector.load %arg3[%c0_3, %c0_4] : memref<1x128xf32, #tpu.memory_space<vmem>>, vector<1x128xf32>
    %4 = vector.broadcast %3 : vector<1x128xf32> to vector<256x128xf32>
    %5 = arith.addf %2, %4 : vector<256x128xf32>
    %6 = arith.truncf %5 : vector<256x128xf32> to vector<256x128xbf16>
    %c0_5 = arith.constant 0 : index
    %c0_6 = arith.constant 0 : index
    %7 = vector.load %arg4[%c0_5, %c0_6] : memref<256x128xbf16, #tpu.memory_space<vmem>>, vector<256x128xbf16>
    tpu.vector_store %arg4[%c0_5, %c0_6], %6 {strides = array<i32>} : memref<256x128xbf16, #tpu.memory_space<vmem>>, vector<256x128xbf16>,
    return
  }
  func.func @transform_0(%arg0: i32) -> (i32, i32) {
    %c0_i32 = arith.constant 0 : i32
    %c0_i32_0 = arith.constant 0 : i32
    return %arg0, %c0_i32 : i32, i32
  }
  func.func @transform_1(%arg0: i32) -> (i32, i32) {
    %c0_i32 = arith.constant 0 : i32
    %c0_i32_0 = arith.constant 0 : i32
    %c0_i32_1 = arith.constant 0 : i32
    return %c0_i32, %c0_i32_0 : i32, i32
  }
  func.func @transform_2(%arg0: i32) -> (i32, i32) {
    %c0_i32 = arith.constant 0 : i32
    %c0_i32_0 = arith.constant 0 : i32
    %c0_i32_1 = arith.constant 0 : i32
    return %c0_i32, %c0_i32_0 : i32, i32
  }
  func.func @transform_3(%arg0: i32) -> (i32, i32) {
    %c0_i32 = arith.constant 0 : i32
    %c0_i32_0 = arith.constant 0 : i32
    return %arg0, %c0_i32 : i32, i32
  }
}

module attributes {stable_mosaic.version = 11 : i64} {
  func.func @propagate_logsoftmax_kernel(%arg0: i32, %arg1: i32, %arg2: memref<256x256xbf16, #tpu.memory_space<vmem>>, %arg3: memref<256x128xbf16, #tpu.memory_space<vmem>>, %arg4: memref<256x128xf32, #tpu.memory_space<vmem>>, %arg5: memref<256x128xf32, #tpu.memory_space<vmem>>) attributes {dimension_semantics = [#tpu.dimension_semantics<parallel>, #tpu.dimension_semantics<arbitrary>], iteration_bounds = array<i64: 1, 1>, scalar_prefetch = 0 : i64, scratch_operands = 1 : i64, tpu.core_type = #tpu.core_type<tc>, window_params = [{transform_indices = @transform_0, window_bounds = array<i64: 256, 256>}, {transform_indices = @transform_1, window_bounds = array<i64: 256, 128>}, {transform_indices = @transform_2, window_bounds = array<i64: 256, 128>}]} {
    %c0_i32 = arith.constant 0 : i32
    %0 = arith.cmpi eq, %arg1, %c0_i32 : i32
    %1 = arith.extui %0 : i1 to i32
    %c0_i32_0 = arith.constant 0 : i32
    %2 = arith.cmpi ne, %1, %c0_i32_0 : i32
    scf.if %2 {
      %cst_10 = arith.constant 0.000000e+00 : f32
      %12 = vector.broadcast %cst_10 : f32 to vector<256x128xf32>
      %c0_11 = arith.constant 0 : index
      %c0_12 = arith.constant 0 : index
      %13 = vector.load %arg5[%c0_11, %c0_12] : memref<256x128xf32, #tpu.memory_space<vmem>>, vector<256x128xf32>
      tpu.vector_store %arg5[%c0_11, %c0_12], %12 {strides = array<i32>} : memref<256x128xf32, #tpu.memory_space<vmem>>, vector<256x128xf32>,
    } else {
    }
    %c0 = arith.constant 0 : index
    %c0_1 = arith.constant 0 : index
    %3 = vector.load %arg5[%c0, %c0_1] : memref<256x128xf32, #tpu.memory_space<vmem>>, vector<256x128xf32>
    %c0_2 = arith.constant 0 : index
    %c0_3 = arith.constant 0 : index
    %4 = vector.load %arg2[%c0_2, %c0_3] : memref<256x256xbf16, #tpu.memory_space<vmem>>, vector<256x256xbf16>
    %c0_4 = arith.constant 0 : index
    %c0_5 = arith.constant 0 : index
    %5 = vector.load %arg3[%c0_4, %c0_5] : memref<256x128xbf16, #tpu.memory_space<vmem>>, vector<256x128xbf16>
    %cst = arith.constant dense<0.000000e+00> : vector<256x128xf32>
    %6 = tpu.matmul %4, %5, %cst {dimension_numbers = #tpu.dot_dimension_numbers<[1], [0], [0], [1], [0, 0, 1, 1], [], []>} : vector<256x256xbf16>, vector<256x128xbf16>, vector<256x128xf32> -> vector<256x128xf32>
    %7 = arith.addf %3, %6 : vector<256x128xf32>
    %c0_6 = arith.constant 0 : index
    %c0_7 = arith.constant 0 : index
    %8 = vector.load %arg5[%c0_6, %c0_7] : memref<256x128xf32, #tpu.memory_space<vmem>>, vector<256x128xf32>
    tpu.vector_store %arg5[%c0_6, %c0_7], %7 {strides = array<i32>} : memref<256x128xf32, #tpu.memory_space<vmem>>, vector<256x128xf32>,
    %c0_i32_8 = arith.constant 0 : i32
    %9 = arith.cmpi eq, %arg1, %c0_i32_8 : i32
    %10 = arith.extui %9 : i1 to i32
    %c0_i32_9 = arith.constant 0 : i32
    %11 = arith.cmpi ne, %10, %c0_i32_9 : i32
    scf.if %11 {
      %c0_10 = arith.constant 0 : index
      %c0_11 = arith.constant 0 : index
      %12 = vector.load %arg5[%c0_10, %c0_11] : memref<256x128xf32, #tpu.memory_space<vmem>>, vector<256x128xf32>
      %13 = tpu.iota {dimensions = array<i32: 1>} : vector<256x128xi32>
      %c2_i32 = arith.constant 2 : i32
      %14 = vector.broadcast %c2_i32 : i32 to vector<256x128xi32>
      %15 = arith.cmpi slt, %13, %14 : vector<256x128xi32>
      %cst_12 = arith.constant -1.000000e+30 : f32
      %16 = vector.broadcast %cst_12 : f32 to vector<256x128xf32>
      %17 = arith.select %15, %12, %16 : vector<256x128xi1>, vector<256x128xf32>
      %cst_13 = arith.constant dense<0xFF800000> : vector<256xf32>
      %18 = vector.multi_reduction <maximumf>, %17, %cst_13 [1] : vector<256x128xf32> to vector<256xf32>
      %19 = vector.shape_cast %18 : vector<256xf32> to vector<256x1xf32>
      %20 = vector.broadcast %19 : vector<256x1xf32> to vector<256x128xf32>
      %21 = arith.subf %17, %20 : vector<256x128xf32>
      %22 = math.exp %21 : vector<256x128xf32>
      %cst_14 = arith.constant dense<0.000000e+00> : vector<256xf32>
      %23 = vector.multi_reduction <add>, %22, %cst_14 [1] : vector<256x128xf32> to vector<256xf32>
      %24 = vector.shape_cast %23 : vector<256xf32> to vector<256x1xf32>
      %25 = math.log %24 : vector<256x1xf32>
      %26 = vector.broadcast %25 : vector<256x1xf32> to vector<256x128xf32>
      %27 = arith.subf %21, %26 : vector<256x128xf32>
      %c0_15 = arith.constant 0 : index
      %c0_16 = arith.constant 0 : index
      %28 = vector.load %arg4[%c0_15, %c0_16] : memref<256x128xf32, #tpu.memory_space<vmem>>, vector<256x128xf32>
      tpu.vector_store %arg4[%c0_15, %c0_16], %27 {strides = array<i32>} : memref<256x128xf32, #tpu.memory_space<vmem>>, vector<256x128xf32>,
    } else {
    }
    return
  }
  func.func @transform_0(%arg0: i32, %arg1: i32) -> (i32, i32) {
    %c0_i32 = arith.constant 0 : i32
    return %arg0, %arg1 : i32, i32
  }
  func.func @transform_1(%arg0: i32, %arg1: i32) -> (i32, i32) {
    %c0_i32 = arith.constant 0 : i32
    %c0_i32_0 = arith.constant 0 : i32
    return %arg1, %c0_i32 : i32, i32
  }
  func.func @transform_2(%arg0: i32, %arg1: i32) -> (i32, i32) {
    %c0_i32 = arith.constant 0 : i32
    %c0_i32_0 = arith.constant 0 : i32
    return %arg0, %c0_i32 : i32, i32
  }
}

</mosaic_0001>

<bundles_post_ra>
// kernel: gcn_net_forward.3
= control target key start
LH: loop header
LB: loop body
LE: loop exit
PB: predicated region body
PF: predicated region fallthrough
CT: control target
= control target key end

     0   :  { %s1012_s1 = inlined_call_operand.vmem [shape: bf16[128,128], index: 1, kind: input, shape index: {}]   ;;  %s1013_s0 = inlined_call_operand.vmem [shape: bf16[256,128], index: 0, kind: input, shape index: {}]   ;;  %s1014_s2 = inlined_call_operand.vmem [shape: f32[1,128], index: 2, kind: input, shape index: {}]   ;;  %s1015_s3 = inlined_call_operand.vmem [shape: bf16[256,128], index: 3, kind: output, shape index: {}]  }
   0x1   :  { %v811_v0 = vld [vmem:[%s1012_s1] sm:$0xff]   ;;  %v812_v1 = vld [vmem:[%s1012_s1 + $0x8] sm:$0xff]   ;;  %v813_v2 = vld [vmem:[%s1012_s1 + $0x10] sm:$0xff]  }
   0x2   :  { %747 = vmatprep.subr.bf16.mxu0 %v811_v0  ;;  %795 = vmatprep.subr.bf16.mxu1 %v811_v0  ;;  %v814_v3 = vld [vmem:[%s1012_s1 + $0x18] sm:$0xff]   ;;  %v819_v4 = vld [vmem:[%s1013_s0] sm:$0xff]   ;;  %v816_v7 = vld [vmem:[%s1012_s1 + $0x28] sm:$0xff]  }
   0x3   :  { %748 = vmatpush3.bf16.msra.mxu0 %v811_v0  ;;  %803 = vmatpush3.bf16.msra.mxu1 %v811_v0  ;;  %v820_v5 = vld [vmem:[%s1013_s0 + $0x40] sm:$0xff]   ;;  %v817_v8 = vld [vmem:[%s1012_s1 + $0x30] sm:$0xff]   ;;  %v818_v9 = vld [vmem:[%s1012_s1 + $0x38] sm:$0xff]  }
   0x4   :  { %749 = vmatprep.subr.bf16.mxu0 %v812_v1  ;;  %796 = vmatprep.subr.bf16.mxu1 %v812_v1  ;;  %v815_v6 = vld [vmem:[%s1012_s1 + $0x20] sm:$0xff]   ;;  %v821_v10 = vld [vmem:[%s1013_s0 + $0x8] sm:$0xff]   ;;  %v823_v12 = vld [vmem:[%s1013_s0 + $0x10] sm:$0xff]  }
   0x5   :  { %763 = vmatprep.mubr.bf16.mxu0 %v819_v4  ;;  %779 = vmatprep.mubr.bf16.mxu1 %v820_v5  ;;  %v822_v11 = vld [vmem:[%s1013_s0 + $0x48] sm:$0xff]   ;;  %v824_v13 = vld [vmem:[%s1013_s0 + $0x50] sm:$0xff]   ;;  %v825_v14 = vld [vmem:[%s1013_s0 + $0x18] sm:$0xff]  }
   0x6   :  { %v826_v15 = vld [vmem:[%s1013_s0 + $0x58] sm:$0xff]   ;;  %v827_v16 = vld [vmem:[%s1013_s0 + $0x20] sm:$0xff]   ;;  %v829_v18 = vld [vmem:[%s1013_s0 + $0x28] sm:$0xff]  }
   0x7   :  { %750 = vmatpush3.bf16.msra.mxu0 %v812_v1  ;;  %804 = vmatpush3.bf16.msra.mxu1 %v812_v1  ;;  %v828_v17 = vld [vmem:[%s1013_s0 + $0x60] sm:$0xff]   ;;  %v830_v19 = vld [vmem:[%s1013_s0 + $0x68] sm:$0xff]   ;;  %v831_v20 = vld [vmem:[%s1013_s0 + $0x30] sm:$0xff]  }
   0x8   :  { %751 = vmatprep.subr.bf16.mxu0 %v813_v2  ;;  %797 = vmatprep.subr.bf16.mxu1 %v813_v2  ;;  %v832_v21 = vld [vmem:[%s1013_s0 + $0x70] sm:$0xff]   ;;  %v833_v22 = vld [vmem:[%s1013_s0 + $0x38] sm:$0xff]   ;;  %v930_v25 = vld [vmem:[%s1014_s2] ss:$0 sm:$0xff] }
   0x9   :  { %v834_v23 = vld [vmem:[%s1013_s0 + $0x78] sm:$0xff]  }
   0xb   :  { %752 = vmatpush3.bf16.msra.mxu0 %v813_v2  ;;  %805 = vmatpush3.bf16.msra.mxu1 %v813_v2 }
   0xc   :  { %753 = vmatprep.subr.bf16.mxu0 %v814_v3  ;;  %798 = vmatprep.subr.bf16.mxu1 %v814_v3 }
   0xf   :  { %754 = vmatpush3.bf16.msra.mxu0 %v814_v3  ;;  %806 = vmatpush3.bf16.msra.mxu1 %v814_v3 }
  0x10   :  { %755 = vmatprep.subr.bf16.mxu0 %v815_v6  ;;  %799 = vmatprep.subr.bf16.mxu1 %v815_v6 }
  0x13   :  { %756 = vmatpush3.bf16.msra.mxu0 %v815_v6  ;;  %807 = vmatpush3.bf16.msra.mxu1 %v815_v6 }
  0x14   :  { %757 = vmatprep.subr.bf16.mxu0 %v816_v7  ;;  %800 = vmatprep.subr.bf16.mxu1 %v816_v7 }
  0x17   :  { %758 = vmatpush3.bf16.msra.mxu0 %v816_v7  ;;  %808 = vmatpush3.bf16.msra.mxu1 %v816_v7 }
  0x18   :  { %759 = vmatprep.subr.bf16.mxu0 %v817_v8  ;;  %801 = vmatprep.subr.bf16.mxu1 %v817_v8 }
  0x1b   :  { %760 = vmatpush3.bf16.msra.mxu0 %v817_v8  ;;  %809 = vmatpush3.bf16.msra.mxu1 %v817_v8 }
  0x1c   :  { %761 = vmatprep.subr.bf16.mxu0 %v818_v9  ;;  %802 = vmatprep.subr.bf16.mxu1 %v818_v9 }
  0x1f   :  { %762 = vmatpush3.bf16.msra.mxu0 %v818_v9  ;;  %810 = vmatpush3.bf16.msra.mxu1 %v818_v9 }
  0x22   :  { %764 = vmatmul.mubr.bf16.vlgmr.msra.gmra.mrb[0].mxu0 %v821_v10  ;;  %780 = vmatmul.mubr.bf16.vlgmr.msra.gmra.mrb[0].mxu1 %v822_v11 }
  0x23   :  { %767 = vmatprep.mubr.bf16.mxu0 %v823_v12  ;;  %783 = vmatprep.mubr.bf16.mxu1 %v824_v13 }
  0x2a   :  { %768 = vmatmul.mubr.bf16.gmra.mrb[4].mxu0 %v825_v14  ;;  %784 = vmatmul.mubr.bf16.gmra.mrb[4].mxu1 %v826_v15 }
  0x2b   :  { %771 = vmatprep.mubr.bf16.mxu0 %v827_v16  ;;  %787 = vmatprep.mubr.bf16.mxu1 %v828_v17 }
  0x32   :  { %772 = vmatmul.mubr.bf16.gmra.mrb[8].mxu0 %v829_v18  ;;  %788 = vmatmul.mubr.bf16.gmra.mrb[8].mxu1 %v830_v19 }
  0x33   :  { %775 = vmatprep.mubr.bf16.mxu0 %v831_v20  ;;  %791 = vmatprep.mubr.bf16.mxu1 %v832_v21 }
  0x3a   :  { %776 = vmatmul.mubr.bf16.gmra.mrb[12].mxu0 %v833_v22  ;;  %792 = vmatmul.mubr.bf16.gmra.mrb[12].mxu1 %v834_v23 }
  0xf5   :  { %v765_v24 = vpop.f32.mrb[0].mxu0  ;;  %v781_v26 = vpop.f32.mrb[0].mxu1 }
  0xf6   :  { %v248_v27 = vpop.f32.mrb[1].mxu0  ;;  %v312_v28 = vpop.f32.mrb[1].mxu1  ;;  %v257_v31 = vadd.f32 %v765_v24, %v930_v25  ;;  %v321_v32 = vadd.f32 %v781_v26, %v930_v25 }
  0xf7   :  { %v766_v29 = vpop.f32.mrb[2].mxu0  ;;  %v782_v30 = vpop.f32.mrb[2].mxu1  ;;  %v249_v37 = vadd.f32 %v930_v25, %v248_v27  ;;  %v313_v38 = vadd.f32 %v930_v25, %v312_v28 }
  0xf8   :  { %v260_v33 = vadd.f32 %v766_v29, %v930_v25  ;;  %v324_v34 = vadd.f32 %v782_v30, %v930_v25  ;;  %v251_v35 = vpop.f32.mrb[3].mxu0  ;;  %v315_v36 = vpop.f32.mrb[3].mxu1 }
  0xf9   :  { %v252_v39 = vadd.f32 %v930_v25, %v251_v35  ;;  %v316_v40 = vadd.f32 %v930_v25, %v315_v36 }
  0xfa   :  { %v636_v41 = vpack.c.bf16 %v260_v33, %v257_v31  ;;  %v676_v42 = vpack.c.bf16 %v324_v34, %v321_v32 }
  0xfb   :  { %v631_v43 = vpack.c.bf16 %v252_v39, %v249_v37  ;;  %v671_v44 = vpack.c.bf16 %v316_v40, %v313_v38 }
  0xfc   :  { %708 = vst [vmem:[%s1015_s3 + $0x8] sm:$0xff] %v636_v41   ;;  %716 = vst [vmem:[%s1015_s3 + $0x48] sm:$0xff] %v676_v42  }
  0xfd   :  { %632 = vst [vmem:[%s1015_s3] sm:$0xff] %v631_v43   ;;  %715 = vst [vmem:[%s1015_s3 + $0x40] sm:$0xff] %v671_v44   ;;  %v769_v45 = vpop.f32.mrb[4].mxu0  ;;  %v785_v46 = vpop.f32.mrb[4].mxu1 }
  0xfe   :  { %v264_v47 = vpop.f32.mrb[5].mxu0  ;;  %v328_v48 = vpop.f32.mrb[5].mxu1  ;;  %v273_v51 = vadd.f32 %v769_v45, %v930_v25  ;;  %v337_v52 = vadd.f32 %v785_v46, %v930_v25 }
  0xff   :  { %v770_v49 = vpop.f32.mrb[6].mxu0  ;;  %v786_v50 = vpop.f32.mrb[6].mxu1  ;;  %v265_v57 = vadd.f32 %v930_v25, %v264_v47  ;;  %v329_v58 = vadd.f32 %v930_v25, %v328_v48 }
 0x100   :  { %v276_v53 = vadd.f32 %v770_v49, %v930_v25  ;;  %v340_v54 = vadd.f32 %v786_v50, %v930_v25  ;;  %v267_v55 = vpop.f32.mrb[7].mxu0  ;;  %v331_v56 = vpop.f32.mrb[7].mxu1 }
 0x101   :  { %v268_v59 = vadd.f32 %v930_v25, %v267_v55  ;;  %v332_v60 = vadd.f32 %v930_v25, %v331_v56 }
 0x102   :  { %v646_v61 = vpack.c.bf16 %v276_v53, %v273_v51  ;;  %v686_v62 = vpack.c.bf16 %v340_v54, %v337_v52 }
 0x103   :  { %v641_v63 = vpack.c.bf16 %v268_v59, %v265_v57  ;;  %v681_v0 = vpack.c.bf16 %v332_v60, %v329_v58 }
 0x104   :  { %710 = vst [vmem:[%s1015_s3 + $0x18] sm:$0xff] %v646_v61   ;;  %718 = vst [vmem:[%s1015_s3 + $0x58] sm:$0xff] %v686_v62  }
 0x105   :  { %709 = vst [vmem:[%s1015_s3 + $0x10] sm:$0xff] %v641_v63   ;;  %717 = vst [vmem:[%s1015_s3 + $0x50] sm:$0xff] %v681_v0   ;;  %v773_v1 = vpop.f32.mrb[8].mxu0  ;;  %v789_v2 = vpop.f32.mrb[8].mxu1 }
 0x106   :  { %v280_v3 = vpop.f32.mrb[9].mxu0  ;;  %v344_v4 = vpop.f32.mrb[9].mxu1  ;;  %v289_v7 = vadd.f32 %v773_v1, %v930_v25  ;;  %v353_v8 = vadd.f32 %v789_v2, %v930_v25 }
 0x107   :  { %v774_v5 = vpop.f32.mrb[10].mxu0  ;;  %v790_v6 = vpop.f32.mrb[10].mxu1  ;;  %v281_v13 = vadd.f32 %v930_v25, %v280_v3  ;;  %v345_v14 = vadd.f32 %v930_v25, %v344_v4 }
 0x108   :  { %v292_v9 = vadd.f32 %v774_v5, %v930_v25  ;;  %v356_v10 = vadd.f32 %v790_v6, %v930_v25  ;;  %v283_v11 = vpop.f32.mrb[11].mxu0  ;;  %v347_v12 = vpop.f32.mrb[11].mxu1 }
 0x109   :  { %v284_v15 = vadd.f32 %v930_v25, %v283_v11  ;;  %v348_v16 = vadd.f32 %v930_v25, %v347_v12 }
 0x10a   :  { %v656_v17 = vpack.c.bf16 %v292_v9, %v289_v7  ;;  %v696_v18 = vpack.c.bf16 %v356_v10, %v353_v8 }
 0x10b   :  { %v651_v19 = vpack.c.bf16 %v284_v15, %v281_v13  ;;  %v691_v20 = vpack.c.bf16 %v348_v16, %v345_v14 }
 0x10c   :  { %712 = vst [vmem:[%s1015_s3 + $0x28] sm:$0xff] %v656_v17   ;;  %720 = vst [vmem:[%s1015_s3 + $0x68] sm:$0xff] %v696_v18  }
 0x10d   :  { %711 = vst [vmem:[%s1015_s3 + $0x20] sm:$0xff] %v651_v19   ;;  %719 = vst [vmem:[%s1015_s3 + $0x60] sm:$0xff] %v691_v20   ;;  %v777_v21 = vpop.f32.mrb[12].mxu0  ;;  %v793_v22 = vpop.f32.mrb[12].mxu1 }
 0x10e   :  { %v296_v23 = vpop.f32.mrb[13].mxu0  ;;  %v360_v24 = vpop.f32.mrb[13].mxu1  ;;  %v305_v28 = vadd.f32 %v777_v21, %v930_v25  ;;  %v369_v29 = vadd.f32 %v793_v22, %v930_v25 }
 0x10f   :  { %v778_v26 = vpop.f32.mrb[14].mxu0  ;;  %v794_v27 = vpop.f32.mrb[14].mxu1  ;;  %v297_v34 = vadd.f32 %v930_v25, %v296_v23  ;;  %v361_v35 = vadd.f32 %v930_v25, %v360_v24 }
 0x110   :  { %v308_v30 = vadd.f32 %v778_v26, %v930_v25  ;;  %v372_v31 = vadd.f32 %v794_v27, %v930_v25  ;;  %v299_v32 = vpop.f32.mrb[15].mxu0  ;;  %v363_v33 = vpop.f32.mrb[15].mxu1 }
 0x111   :  { %v300_v36 = vadd.f32 %v930_v25, %v299_v32  ;;  %v364_v37 = vadd.f32 %v930_v25, %v363_v33 }
 0x112   :  { %v666_v38 = vpack.c.bf16 %v308_v30, %v305_v28  ;;  %v706_v39 = vpack.c.bf16 %v372_v31, %v369_v29 }
 0x113   :  { %v661_v40 = vpack.c.bf16 %v300_v36, %v297_v34  ;;  %v701_v41 = vpack.c.bf16 %v364_v37, %v361_v35 }
 0x114   :  { %714 = vst [vmem:[%s1015_s3 + $0x38] sm:$0xff] %v666_v38   ;;  %722 = vst [vmem:[%s1015_s3 + $0x78] sm:$0xff] %v706_v39  }
 0x115   :  { %713 = vst [vmem:[%s1015_s3 + $0x30] sm:$0xff] %v661_v40   ;;  %721 = vst [vmem:[%s1015_s3 + $0x70] sm:$0xff] %v701_v41  }

// kernel: gcn_net_forward.4
= control target key start
LH: loop header
LB: loop body
LE: loop exit
PB: predicated region body
PF: predicated region fallthrough
CT: control target
= control target key end

     0   :  { %s1888_s1 = inlined_call_operand.vmem [shape: bf16[256,128], index: 1, kind: input, shape index: {}]   ;;  %s1889_s0 = inlined_call_operand.vmem [shape: bf16[256,256], index: 0, kind: input, shape index: {}]   ;;  %s1890_s2 = inlined_call_operand.vmem [shape: bf16[128,128], index: 2, kind: input, shape index: {}]   ;;  %s1891_s3 = inlined_call_operand.vmem [shape: f32[1,128], index: 3, kind: input, shape index: {}]   ;;  %s1892_s4 = inlined_call_operand.vmem [shape: bf16[256,128], index: 4, kind: output, shape index: {}]  }
   0x1   :  { %v1526_v0 = vld [vmem:[%s1888_s1 + $0x40] sm:$0xff]   ;;  %v1528_v2 = vld [vmem:[%s1888_s1 + $0x48] sm:$0xff]   ;;  %v1530_v4 = vld [vmem:[%s1888_s1 + $0x50] sm:$0xff]  }
   0x2   :  { %v1527_v1 = vld [vmem:[%s1888_s1] sm:$0xff]   ;;  %1326 = vmatprep.subr.bf16.mxu0 %v1526_v0  ;;  %1510 = vmatprep.subr.bf16.mxu1 %v1526_v0  ;;  %v1529_v3 = vld [vmem:[%s1888_s1 + $0x8] sm:$0xff]   ;;  %v1531_v5 = vld [vmem:[%s1888_s1 + $0x10] sm:$0xff]  }
   0x3   :  { %1327 = vmatpush3.bf16.msra.mxu0 %v1527_v1  ;;  %1518 = vmatpush3.bf16.msra.mxu1 %v1527_v1  ;;  %v1532_v6 = vld [vmem:[%s1888_s1 + $0x58] sm:$0xff]   ;;  %v1534_v8 = vld [vmem:[%s1888_s1 + $0x60] sm:$0xff]   ;;  %v1536_v10 = vld [vmem:[%s1888_s1 + $0x68] sm:$0xff]  }
   0x4   :  { %1328 = vmatprep.subr.bf16.mxu0 %v1528_v2  ;;  %1511 = vmatprep.subr.bf16.mxu1 %v1528_v2  ;;  %v1533_v7 = vld [vmem:[%s1888_s1 + $0x18] sm:$0xff]   ;;  %v1535_v9 = vld [vmem:[%s1888_s1 + $0x20] sm:$0xff]   ;;  %v1537_v12 = vld [vmem:[%s1888_s1 + $0x28] sm:$0xff]  }
   0x5   :  { %v1544_v11 = vld [vmem:[%s1889_s0 + $0x4] ss:$8 sps:$4 sm:$0xff]   ;;  %v1538_v13 = vld [vmem:[%s1888_s1 + $0x70] sm:$0xff]   ;;  %v1540_v15 = vld [vmem:[%s1888_s1 + $0x78] sm:$0xff]  }
   0x6   :  { %438 = vmatprep.mubr.bf16.mxu0 %v1544_v11  ;;  %v1539_v14 = vld [vmem:[%s1888_s1 + $0x30] sm:$0xff]   ;;  %v1541_v16 = vld [vmem:[%s1888_s1 + $0x38] sm:$0xff]   ;;  %v1542_v17 = vld [vmem:[%s1889_s0] ss:$8 sps:$4 sm:$0xff]  }
   0x7   :  { %1329 = vmatpush3.bf16.msra.mxu0 %v1529_v3  ;;  %1519 = vmatpush3.bf16.msra.mxu1 %v1529_v3  ;;  %v1574_v18 = vld [vmem:[%s1889_s0 + $0xc4] ss:$8 sps:$4 sm:$0xff]   ;;  %v1545_v19 = vld [vmem:[%s1889_s0 + $0x14] ss:$8 sps:$4 sm:$0xff]   ;;  %v1572_v20 = vld [vmem:[%s1889_s0 + $0xc0] ss:$8 sps:$4 sm:$0xff]  }
   0x8   :  { %1330 = vmatprep.subr.bf16.mxu0 %v1530_v4  ;;  %1512 = vmatprep.subr.bf16.mxu1 %v1530_v4  ;;  %v1578_v21 = vld [vmem:[%s1889_s0 + $0xd4] ss:$8 sps:$4 sm:$0xff]   ;;  %v1547_v22 = vld [vmem:[%s1889_s0 + $0x10] ss:$8 sps:$4 sm:$0xff]   ;;  %v1548_v23 = vld [vmem:[%s1889_s0 + $0x24] ss:$8 sps:$4 sm:$0xff]  }
   0x9   :  { %534 = vmatprep.mubr.bf16.mxu1 %v1574_v18  ;;  %v1580_v24 = vld [vmem:[%s1889_s0 + $0xd0] ss:$8 sps:$4 sm:$0xff]   ;;  %v1590_v25 = vld [vmem:[%s1890_s2] sm:$0xff]   ;;  %v1591_v26 = vld [vmem:[%s1890_s2 + $0x8] sm:$0xff]  }
   0xa   :  { %v1584_v27 = vld [vmem:[%s1889_s0 + $0xe4] ss:$8 sps:$4 sm:$0xff]   ;;  %v1592_v28 = vld [vmem:[%s1890_s2 + $0x10] sm:$0xff]   ;;  %v1550_v29 = vld [vmem:[%s1889_s0 + $0x20] ss:$8 sps:$4 sm:$0xff]  }
   0xb   :  { %1331 = vmatpush3.bf16.msra.mxu0 %v1531_v5  ;;  %1520 = vmatpush3.bf16.msra.mxu1 %v1531_v5  ;;  %v1593_v30 = vld [vmem:[%s1890_s2 + $0x18] sm:$0xff]   ;;  %v1586_v32 = vld [vmem:[%s1889_s0 + $0xe0] ss:$8 sps:$4 sm:$0xff]   ;;  %v1554_v35 = vld [vmem:[%s1889_s0 + $0x44] ss:$8 sps:$4 sm:$0xff]  }
   0xc   :  { %1332 = vmatprep.subr.bf16.mxu0 %v1532_v6  ;;  %1513 = vmatprep.subr.bf16.mxu1 %v1532_v6  ;;  %v1551_v31 = vld [vmem:[%s1889_s0 + $0x34] ss:$8 sps:$4 sm:$0xff]   ;;  %v1553_v34 = vld [vmem:[%s1889_s0 + $0x30] ss:$8 sps:$4 sm:$0xff]   ;;  %v1556_v37 = vld [vmem:[%s1889_s0 + $0x40] ss:$8 sps:$4 sm:$0xff]  }
   0xd   :  { %v1587_v33 = vld [vmem:[%s1889_s0 + $0xf4] ss:$8 sps:$4 sm:$0xff]   ;;  %v1589_v36 = vld [vmem:[%s1889_s0 + $0xf0] ss:$8 sps:$4 sm:$0xff]   ;;  %v1560_v40 = vld [vmem:[%s1889_s0 + $0x64] ss:$8 sps:$4 sm:$0xff]  }
   0xe   :  { %v1557_v38 = vld [vmem:[%s1889_s0 + $0x54] ss:$8 sps:$4 sm:$0xff]   ;;  %v1559_v39 = vld [vmem:[%s1889_s0 + $0x50] ss:$8 sps:$4 sm:$0xff]   ;;  %v1562_v41 = vld [vmem:[%s1889_s0 + $0x60] ss:$8 sps:$4 sm:$0xff]  }
   0xf   :  { %1333 = vmatpush3.bf16.msra.mxu0 %v1533_v7  ;;  %1521 = vmatpush3.bf16.msra.mxu1 %v1533_v7  ;;  %v1563_v42 = vld [vmem:[%s1889_s0 + $0x74] ss:$8 sps:$4 sm:$0xff]   ;;  %v1565_v43 = vld [vmem:[%s1889_s0 + $0x70] ss:$8 sps:$4 sm:$0xff]   ;;  %v1566_v44 = vld [vmem:[%s1889_s0 + $0x84] ss:$8 sps:$4 sm:$0xff]  }
  0x10   :  { %1334 = vmatprep.subr.bf16.mxu0 %v1534_v8  ;;  %1514 = vmatprep.subr.bf16.mxu1 %v1534_v8  ;;  %v1568_v45 = vld [vmem:[%s1889_s0 + $0x80] ss:$8 sps:$4 sm:$0xff]   ;;  %v1569_v46 = vld [vmem:[%s1889_s0 + $0x94] ss:$8 sps:$4 sm:$0xff]   ;;  %v1571_v47 = vld [vmem:[%s1889_s0 + $0x90] ss:$8 sps:$4 sm:$0xff]  }
  0x11   :  { %v1575_v48 = vld [vmem:[%s1889_s0 + $0xa4] ss:$8 sps:$4 sm:$0xff]   ;;  %v1577_v49 = vld [vmem:[%s1889_s0 + $0xa0] ss:$8 sps:$4 sm:$0xff]   ;;  %v1581_v50 = vld [vmem:[%s1889_s0 + $0xb4] ss:$8 sps:$4 sm:$0xff]  }
  0x12   :  { %v1594_v51 = vld [vmem:[%s1890_s2 + $0x20] sm:$0xff]   ;;  %v1583_v52 = vld [vmem:[%s1889_s0 + $0xb0] ss:$8 sps:$4 sm:$0xff]   ;;  %v1595_v53 = vld [vmem:[%s1890_s2 + $0x28] sm:$0xff]  }
  0x13   :  { %1335 = vmatpush3.bf16.msra.mxu0 %v1535_v9  ;;  %1522 = vmatpush3.bf16.msra.mxu1 %v1535_v9  ;;  %v1596_v54 = vld [vmem:[%s1890_s2 + $0x30] sm:$0xff]   ;;  %v1597_v55 = vld [vmem:[%s1890_s2 + $0x38] sm:$0xff]  }
  0x14   :  { %1336 = vmatprep.subr.bf16.mxu0 %v1536_v10  ;;  %1515 = vmatprep.subr.bf16.mxu1 %v1536_v10 }
  0x17   :  { %1337 = vmatpush3.bf16.msra.mxu0 %v1537_v12  ;;  %1523 = vmatpush3.bf16.msra.mxu1 %v1537_v12 }
  0x18   :  { %1338 = vmatprep.subr.bf16.mxu0 %v1538_v13  ;;  %1516 = vmatprep.subr.bf16.mxu1 %v1538_v13 }
  0x1b   :  { %1339 = vmatpush3.bf16.msra.mxu0 %v1539_v14  ;;  %1524 = vmatpush3.bf16.msra.mxu1 %v1539_v14 }
  0x1c   :  { %1340 = vmatprep.subr.bf16.mxu0 %v1540_v15  ;;  %1517 = vmatprep.subr.bf16.mxu1 %v1540_v15 }
  0x1f   :  { %1341 = vmatpush3.bf16.msra.mxu0 %v1541_v16  ;;  %1525 = vmatpush3.bf16.msra.mxu1 %v1541_v16 }
  0x20   :  { %1462 = vmatprep.subr.bf16.mxu1 %v1590_v25 }
  0x22   :  { %439 = vmatmul.mubr.bf16.vlgmr.msra.gmra.mrb[0].mxu0 %v1542_v17  ;;  %535 = vmatmul.mubr.bf16.vlgmr.msra.gmra.mrb[0].mxu1 %v1572_v20 }
  0x23   :  { %446 = vmatprep.mubr.bf16.mxu0 %v1545_v19  ;;  %542 = vmatprep.mubr.bf16.mxu1 %v1578_v21 }
  0x24   :  { %1463 = vmatpush3.bf16.msra.mxu1 %v1590_v25 }
  0x25   :  { %1464 = vmatprep.subr.bf16.mxu1 %v1591_v26 }
  0x28   :  { %1465 = vmatpush3.bf16.msra.mxu1 %v1591_v26 }
  0x29   :  { %1466 = vmatprep.subr.bf16.mxu1 %v1592_v28 }
  0x2a   :  { %447 = vmatmul.mubr.bf16.gmra.mrb[4].mxu0 %v1547_v22  ;;  %543 = vmatmul.mubr.bf16.gmra.mrb[4].mxu1 %v1580_v24 }
  0x2b   :  { %454 = vmatprep.mubr.bf16.mxu0 %v1548_v23  ;;  %550 = vmatprep.mubr.bf16.mxu1 %v1584_v27 }
  0x2c   :  { %1467 = vmatpush3.bf16.msra.mxu1 %v1592_v28 }
  0x2d   :  { %1468 = vmatprep.subr.bf16.mxu1 %v1593_v30 }
  0x30   :  { %1469 = vmatpush3.bf16.msra.mxu1 %v1593_v30 }
  0x31   :  { %1470 = vmatprep.subr.bf16.mxu1 %v1594_v51 }
  0x32   :  { %455 = vmatmul.mubr.bf16.gmra.mrb[8].mxu0 %v1550_v29  ;;  %551 = vmatmul.mubr.bf16.gmra.mrb[8].mxu1 %v1586_v32 }
  0x33   :  { %462 = vmatprep.mubr.bf16.mxu0 %v1551_v31  ;;  %558 = vmatprep.mubr.bf16.mxu1 %v1587_v33 }
  0x34   :  { %1471 = vmatpush3.bf16.msra.mxu1 %v1594_v51 }
  0x35   :  { %1472 = vmatprep.subr.bf16.mxu1 %v1595_v53 }
  0x38   :  { %1473 = vmatpush3.bf16.msra.mxu1 %v1595_v53 }
  0x39   :  { %1474 = vmatprep.subr.bf16.mxu1 %v1596_v54 }
  0x3a   :  { %463 = vmatmul.mubr.bf16.gmra.mrb[12].mxu0 %v1553_v34  ;;  %559 = vmatmul.mubr.bf16.gmra.mrb[12].mxu1 %v1589_v36 }
  0x3b   :  { %470 = vmatprep.mubr.bf16.mxu0 %v1554_v35 }
  0x3c   :  { %1475 = vmatpush3.bf16.msra.mxu1 %v1596_v54 }
  0x3d   :  { %1476 = vmatprep.subr.bf16.mxu1 %v1597_v55 }
  0x40   :  { %1477 = vmatpush3.bf16.msra.mxu1 %v1597_v55 }
  0x42   :  { %471 = vmatmul.mubr.bf16.gmra.mrb[16].mxu0 %v1556_v37 }
  0x43   :  { %478 = vmatprep.mubr.bf16.mxu0 %v1557_v38 }
  0x4a   :  { %479 = vmatmul.mubr.bf16.gmra.mrb[20].mxu0 %v1559_v39 }
  0x4b   :  { %486 = vmatprep.mubr.bf16.mxu0 %v1560_v40 }
  0x52   :  { %487 = vmatmul.mubr.bf16.gmra.mrb[24].mxu0 %v1562_v41 }
  0x53   :  { %494 = vmatprep.mubr.bf16.mxu0 %v1563_v42 }
  0x5a   :  { %495 = vmatmul.mubr.bf16.gmra.mrb[28].mxu0 %v1565_v43 }
  0x5b   :  { %502 = vmatprep.mubr.bf16.mxu0 %v1566_v44 }
  0x62   :  { %503 = vmatmul.mubr.bf16.gmra.mrb[32].mxu0 %v1568_v45 }
  0x63   :  { %510 = vmatprep.mubr.bf16.mxu0 %v1569_v46 }
  0x6a   :  { %511 = vmatmul.mubr.bf16.gmra.mrb[36].mxu0 %v1571_v47 }
  0x6b   :  { %518 = vmatprep.mubr.bf16.mxu0 %v1575_v48 }
  0x72   :  { %519 = vmatmul.mubr.bf16.gmra.mrb[40].mxu0 %v1577_v49 }
  0x73   :  { %526 = vmatprep.mubr.bf16.mxu0 %v1581_v50 }
  0x7a   :  { %527 = vmatmul.mubr.bf16.gmra.mrb[44].mxu0 %v1583_v52 }
  0xf5   :  { %v1342_v56 = vpop.f32.mrb[0].mxu0  ;;  %v1414_v58 = vpop.f32.mrb[0].mxu1 }
  0xf6   :  { %v1343_v57 = vpop.f32.mrb[1].mxu0  ;;  %v1415_v61 = vpop.f32.mrb[1].mxu1 }
  0xf7   :  { %v1344_v59 = vadd.f32 %v1343_v57, %v1342_v56  ;;  %v1345_v60 = vpop.f32.mrb[2].mxu0  ;;  %v1416_v63 = vadd.f32 %v1415_v61, %v1414_v58  ;;  %v1417_v0 = vpop.f32.mrb[2].mxu1 }
  0xf8   :  { %v1346_v62 = vpop.f32.mrb[3].mxu0  ;;  %v1418_v2 = vpop.f32.mrb[3].mxu1 }
  0xf9   :  { %v1347_v1 = vadd.f32 %v1346_v62, %v1345_v60  ;;  %v690_v3 = vmax.f32 %v1416_v63, 0.0  ;;  %v1419_v4 = vadd.f32 %v1418_v2, %v1417_v0  ;;  %v666_v5 = vmax.f32 %v1344_v59, 0.0 }
  0xfb   :  { %v667_v6 = vmax.f32 %v1347_v1, 0.0  ;;  %v691_v7 = vmax.f32 %v1419_v4, 0.0 }
  0xfd   :  { %v698_v8 = vpack.c.bf16 %v667_v6, %v666_v5  ;;  %v1348_v9 = vpop.f32.mrb[4].mxu0  ;;  %v1791_v11 = vpack.c.bf16 %v691_v7, %v690_v3  ;;  %v1420_v12 = vpop.f32.mrb[4].mxu1 }
  0xfe   :  { %v1349_v10 = vpop.f32.mrb[5].mxu0  ;;  %v1421_v15 = vpop.f32.mrb[5].mxu1 }
  0xff   :  { %v1350_v13 = vadd.f32 %v1349_v10, %v1348_v9  ;;  %v1351_v14 = vpop.f32.mrb[6].mxu0  ;;  %1478 = vmatprep.mubr.bf16.mxu1 %v698_v8  ;;  %v1422_v17 = vadd.f32 %v1421_v15, %v1420_v12  ;;  %v1423_v18 = vpop.f32.mrb[6].mxu1 }
 0x100   :  { %v1352_v16 = vpop.f32.mrb[7].mxu0  ;;  %v1424_v20 = vpop.f32.mrb[7].mxu1 }
 0x101   :  { %v1353_v19 = vadd.f32 %v1352_v16, %v1351_v14  ;;  %v692_v21 = vmax.f32 %v1422_v17, 0.0  ;;  %v1425_v22 = vadd.f32 %v1424_v20, %v1423_v18  ;;  %v668_v23 = vmax.f32 %v1350_v13, 0.0 }
 0x103   :  { %v669_v24 = vmax.f32 %v1353_v19, 0.0  ;;  %v693_v25 = vmax.f32 %v1425_v22, 0.0 }
 0x105   :  { %v699_v26 = vpack.c.bf16 %v669_v24, %v668_v23  ;;  %v1354_v27 = vpop.f32.mrb[8].mxu0  ;;  %v1793_v29 = vpack.c.bf16 %v693_v25, %v692_v21  ;;  %v1426_v30 = vpop.f32.mrb[8].mxu1 }
 0x106   :  { %v1355_v28 = vpop.f32.mrb[9].mxu0  ;;  %v1427_v33 = vpop.f32.mrb[9].mxu1 }
 0x107   :  { %v1356_v31 = vadd.f32 %v1355_v28, %v1354_v27  ;;  %v1357_v32 = vpop.f32.mrb[10].mxu0  ;;  %1479 = vmatmul.mubr.bf16.vlgmr.msra.gmra.mrb[16].mxu1 %v699_v26  ;;  %v1428_v35 = vadd.f32 %v1427_v33, %v1426_v30  ;;  %v1429_v36 = vpop.f32.mrb[10].mxu1 }
 0x108   :  { %v1358_v34 = vpop.f32.mrb[11].mxu0  ;;  %v1430_v38 = vpop.f32.mrb[11].mxu1 }
 0x109   :  { %v1359_v37 = vadd.f32 %v1358_v34, %v1357_v32  ;;  %v694_v39 = vmax.f32 %v1428_v35, 0.0  ;;  %v1431_v40 = vadd.f32 %v1430_v38, %v1429_v36  ;;  %v670_v41 = vmax.f32 %v1356_v31, 0.0 }
 0x10b   :  { %v671_v42 = vmax.f32 %v1359_v37, 0.0  ;;  %v695_v43 = vmax.f32 %v1431_v40, 0.0 }
 0x10d   :  { %v700_v44 = vpack.c.bf16 %v671_v42, %v670_v41  ;;  %v1360_v45 = vpop.f32.mrb[12].mxu0  ;;  %v1795_v47 = vpack.c.bf16 %v695_v43, %v694_v39  ;;  %v1432_v48 = vpop.f32.mrb[12].mxu1 }
 0x10e   :  { %v1361_v46 = vpop.f32.mrb[13].mxu0  ;;  %v1433_v51 = vpop.f32.mrb[13].mxu1 }
 0x10f   :  { %v1362_v49 = vadd.f32 %v1361_v46, %v1360_v45  ;;  %v1363_v50 = vpop.f32.mrb[14].mxu0  ;;  %1482 = vmatprep.mubr.bf16.mxu1 %v700_v44  ;;  %v1434_v53 = vadd.f32 %v1433_v51, %v1432_v48  ;;  %v1435_v54 = vpop.f32.mrb[14].mxu1 }
 0x110   :  { %v1364_v52 = vpop.f32.mrb[15].mxu0  ;;  %v1436_v56 = vpop.f32.mrb[15].mxu1 }
 0x111   :  { %v1365_v55 = vadd.f32 %v1364_v52, %v1363_v50  ;;  %v696_v57 = vmax.f32 %v1434_v53, 0.0  ;;  %v1437_v58 = vadd.f32 %v1436_v56, %v1435_v54  ;;  %v672_v59 = vmax.f32 %v1362_v49, 0.0 }
 0x113   :  { %v673_v60 = vmax.f32 %v1365_v55, 0.0  ;;  %v697_v61 = vmax.f32 %v1437_v58, 0.0 }
 0x115   :  { %v701_v62 = vpack.c.bf16 %v673_v60, %v672_v59  ;;  %v1366_v63 = vpop.f32.mrb[16].mxu0  ;;  %v1797_v1 = vpack.c.bf16 %v697_v61, %v696_v57 }
 0x116   :  { %v1367_v0 = vpop.f32.mrb[17].mxu0 }
 0x117   :  { %v1368_v2 = vadd.f32 %v1367_v0, %v1366_v63  ;;  %v1369_v3 = vpop.f32.mrb[18].mxu0  ;;  %1483 = vmatmul.mubr.bf16.gmra.mrb[20].mxu1 %v701_v62 }
 0x118   :  { %v1370_v4 = vpop.f32.mrb[19].mxu0 }
 0x119   :  { %v1371_v5 = vadd.f32 %v1370_v4, %v1369_v3  ;;  %v674_v6 = vmax.f32 %v1368_v2, 0.0 }
 0x11b   :  { %v675_v7 = vmax.f32 %v1371_v5, 0.0 }
 0x11d   :  { %v702_v8 = vpack.c.bf16 %v675_v7, %v674_v6  ;;  %v1372_v9 = vpop.f32.mrb[20].mxu0 }
 0x11e   :  { %v1373_v10 = vpop.f32.mrb[21].mxu0 }
 0x11f   :  { %v1374_v12 = vadd.f32 %v1373_v10, %v1372_v9  ;;  %v1375_v13 = vpop.f32.mrb[22].mxu0  ;;  %1486 = vmatprep.mubr.bf16.mxu1 %v702_v8 }
 0x120   :  { %v1376_v14 = vpop.f32.mrb[23].mxu0 }
 0x121   :  { %v1377_v15 = vadd.f32 %v1376_v14, %v1375_v13  ;;  %v676_v16 = vmax.f32 %v1374_v12, 0.0  ;;  %v1806_v14 = vld [vmem:[%s1891_s3] ss:$0 sm:$0xff] }
 0x123   :  { %v677_v17 = vmax.f32 %v1377_v15, 0.0 }
 0x125   :  { %v703_v18 = vpack.c.bf16 %v677_v17, %v676_v16  ;;  %v1378_v19 = vpop.f32.mrb[24].mxu0 }
 0x126   :  { %v1379_v20 = vpop.f32.mrb[25].mxu0 }
 0x127   :  { %v1380_v21 = vadd.f32 %v1379_v20, %v1378_v19  ;;  %v1381_v22 = vpop.f32.mrb[26].mxu0  ;;  %1487 = vmatmul.mubr.bf16.gmra.mrb[24].mxu1 %v703_v18 }
 0x128   :  { %v1382_v23 = vpop.f32.mrb[27].mxu0 }
 0x129   :  { %v1383_v24 = vadd.f32 %v1382_v23, %v1381_v22  ;;  %v678_v25 = vmax.f32 %v1380_v21, 0.0 }
 0x12b   :  { %v679_v26 = vmax.f32 %v1383_v24, 0.0 }
 0x12d   :  { %v704_v27 = vpack.c.bf16 %v679_v26, %v678_v25  ;;  %v1384_v28 = vpop.f32.mrb[28].mxu0 }
 0x12e   :  { %v1385_v30 = vpop.f32.mrb[29].mxu0 }
 0x12f   :  { %v1386_v31 = vadd.f32 %v1385_v30, %v1384_v28  ;;  %v1387_v32 = vpop.f32.mrb[30].mxu0  ;;  %1490 = vmatprep.mubr.bf16.mxu1 %v704_v27 }
 0x130   :  { %v1388_v33 = vpop.f32.mrb[31].mxu0 }
 0x131   :  { %v1389_v34 = vadd.f32 %v1388_v33, %v1387_v32  ;;  %v680_v35 = vmax.f32 %v1386_v31, 0.0 }
 0x133   :  { %v681_v36 = vmax.f32 %v1389_v34, 0.0 }
 0x135   :  { %v705_v37 = vpack.c.bf16 %v681_v36, %v680_v35  ;;  %v1390_v38 = vpop.f32.mrb[32].mxu0 }
 0x136   :  { %v1391_v39 = vpop.f32.mrb[33].mxu0 }
 0x137   :  { %v1392_v40 = vadd.f32 %v1391_v39, %v1390_v38  ;;  %v1393_v41 = vpop.f32.mrb[34].mxu0  ;;  %1491 = vmatmul.mubr.bf16.gmra.mrb[28].mxu1 %v705_v37 }
 0x138   :  { %v1394_v42 = vpop.f32.mrb[35].mxu0 }
 0x139   :  { %v1395_v43 = vadd.f32 %v1394_v42, %v1393_v41  ;;  %v682_v44 = vmax.f32 %v1392_v40, 0.0 }
 0x13b   :  { %v683_v45 = vmax.f32 %v1395_v43, 0.0 }
 0x13d   :  { %v706_v46 = vpack.c.bf16 %v683_v45, %v682_v44  ;;  %v1396_v48 = vpop.f32.mrb[36].mxu0 }
 0x13e   :  { %v1397_v49 = vpop.f32.mrb[37].mxu0 }
 0x13f   :  { %v1398_v50 = vadd.f32 %v1397_v49, %v1396_v48  ;;  %v1399_v51 = vpop.f32.mrb[38].mxu0  ;;  %1494 = vmatprep.mubr.bf16.mxu1 %v706_v46 }
 0x140   :  { %v1400_v52 = vpop.f32.mrb[39].mxu0 }
 0x141   :  { %v1401_v53 = vadd.f32 %v1400_v52, %v1399_v51  ;;  %v684_v54 = vmax.f32 %v1398_v50, 0.0 }
 0x143   :  { %v685_v55 = vmax.f32 %v1401_v53, 0.0 }
 0x145   :  { %v707_v56 = vpack.c.bf16 %v685_v55, %v684_v54  ;;  %v1402_v57 = vpop.f32.mrb[40].mxu0 }
 0x146   :  { %v1403_v58 = vpop.f32.mrb[41].mxu0 }
 0x147   :  { %v1404_v59 = vadd.f32 %v1403_v58, %v1402_v57  ;;  %v1405_v60 = vpop.f32.mrb[42].mxu0  ;;  %1495 = vmatmul.mubr.bf16.gmra.mrb[32].mxu1 %v707_v56 }
 0x148   :  { %v1406_v61 = vpop.f32.mrb[43].mxu0 }
 0x149   :  { %v1407_v62 = vadd.f32 %v1406_v61, %v1405_v60  ;;  %v686_v63 = vmax.f32 %v1404_v59, 0.0 }
 0x14b   :  { %v687_v0 = vmax.f32 %v1407_v62, 0.0 }
 0x14d   :  { %v708_v2 = vpack.c.bf16 %v687_v0, %v686_v63  ;;  %v1408_v3 = vpop.f32.mrb[44].mxu0 }
 0x14e   :  { %v1409_v4 = vpop.f32.mrb[45].mxu0 }
 0x14f   :  { %v1410_v5 = vadd.f32 %v1409_v4, %v1408_v3  ;;  %v1411_v6 = vpop.f32.mrb[46].mxu0  ;;  %1498 = vmatprep.mubr.bf16.mxu1 %v708_v2 }
 0x150   :  { %v1412_v7 = vpop.f32.mrb[47].mxu0 }
 0x151   :  { %v1413_v8 = vadd.f32 %v1412_v7, %v1411_v6  ;;  %v688_v9 = vmax.f32 %v1410_v5, 0.0 }
 0x153   :  { %v689_v10 = vmax.f32 %v1413_v8, 0.0 }
 0x155   :  { %v709_v12 = vpack.c.bf16 %v689_v10, %v688_v9 }
 0x157   :  { %1499 = vmatmul.mubr.bf16.gmra.mrb[36].mxu1 %v709_v12 }
 0x158   :  { %1502 = vmatprep.mubr.bf16.mxu1 %v1791_v11 }
 0x15f   :  { %1503 = vmatmul.mubr.bf16.gmra.mrb[40].mxu1 %v1793_v29 }
 0x160   :  { %1506 = vmatprep.mubr.bf16.mxu1 %v1795_v47 }
 0x167   :  { %1507 = vmatmul.mubr.bf16.gmra.mrb[44].mxu1 %v1797_v1 }
 0x1da   :  { %v1480_v13 = vpop.f32.mrb[16].mxu1 }
 0x1db   :  { %v819_v15 = vpop.f32.mrb[17].mxu1  ;;  %v828_v17 = vadd.f32 %v1480_v13, %v1806_v14 }
 0x1dc   :  { %v1481_v16 = vpop.f32.mrb[18].mxu1  ;;  %v820_v11 = vadd.f32 %v1806_v14, %v819_v15 }
 0x1dd   :  { %v831_v18 = vadd.f32 %v1481_v16, %v1806_v14  ;;  %v822_v19 = vpop.f32.mrb[19].mxu1 }
 0x1de   :  { %v823_v29 = vadd.f32 %v1806_v14, %v822_v19 }
 0x1df   :  { %v1239_v47 = vpack.c.bf16 %v831_v18, %v828_v17 }
 0x1e0   :  { %v1234_v20 = vpack.c.bf16 %v823_v29, %v820_v11 }
 0x1e1   :  { %1311 = vst [vmem:[%s1892_s4 + $0x8] sm:$0xff] %v1239_v47  }
 0x1e2   :  { %1235 = vst [vmem:[%s1892_s4] sm:$0xff] %v1234_v20  }
 0x1ea   :  { %v1484_v1 = vpop.f32.mrb[20].mxu1 }
 0x1eb   :  { %v835_v21 = vpop.f32.mrb[21].mxu1  ;;  %v844_v23 = vadd.f32 %v1484_v1, %v1806_v14 }
 0x1ec   :  { %v1485_v22 = vpop.f32.mrb[22].mxu1  ;;  %v836_v26 = vadd.f32 %v1806_v14, %v835_v21 }
 0x1ed   :  { %v847_v24 = vadd.f32 %v1485_v22, %v1806_v14  ;;  %v838_v25 = vpop.f32.mrb[23].mxu1 }
 0x1ee   :  { %v839_v27 = vadd.f32 %v1806_v14, %v838_v25 }
 0x1ef   :  { %v1249_v28 = vpack.c.bf16 %v847_v24, %v844_v23 }
 0x1f0   :  { %v1244_v30 = vpack.c.bf16 %v839_v27, %v836_v26 }
 0x1f1   :  { %1313 = vst [vmem:[%s1892_s4 + $0x18] sm:$0xff] %v1249_v28  }
 0x1f2   :  { %1312 = vst [vmem:[%s1892_s4 + $0x10] sm:$0xff] %v1244_v30  }
 0x1fa   :  { %v1488_v31 = vpop.f32.mrb[24].mxu1 }
 0x1fb   :  { %v851_v32 = vpop.f32.mrb[25].mxu1  ;;  %v860_v34 = vadd.f32 %v1488_v31, %v1806_v14 }
 0x1fc   :  { %v1489_v33 = vpop.f32.mrb[26].mxu1  ;;  %v852_v37 = vadd.f32 %v1806_v14, %v851_v32 }
 0x1fd   :  { %v863_v35 = vadd.f32 %v1489_v33, %v1806_v14  ;;  %v854_v36 = vpop.f32.mrb[27].mxu1 }
 0x1fe   :  { %v855_v38 = vadd.f32 %v1806_v14, %v854_v36 }
 0x1ff   :  { %v1259_v39 = vpack.c.bf16 %v863_v35, %v860_v34 }
 0x200   :  { %v1254_v40 = vpack.c.bf16 %v855_v38, %v852_v37 }
 0x201   :  { %1315 = vst [vmem:[%s1892_s4 + $0x28] sm:$0xff] %v1259_v39  }
 0x202   :  { %1314 = vst [vmem:[%s1892_s4 + $0x20] sm:$0xff] %v1254_v40  }
 0x20a   :  { %v1492_v41 = vpop.f32.mrb[28].mxu1 }
 0x20b   :  { %v867_v42 = vpop.f32.mrb[29].mxu1  ;;  %v876_v44 = vadd.f32 %v1492_v41, %v1806_v14 }
 0x20c   :  { %v1493_v43 = vpop.f32.mrb[30].mxu1  ;;  %v868_v48 = vadd.f32 %v1806_v14, %v867_v42 }
 0x20d   :  { %v879_v45 = vadd.f32 %v1493_v43, %v1806_v14  ;;  %v870_v46 = vpop.f32.mrb[31].mxu1 }
 0x20e   :  { %v871_v49 = vadd.f32 %v1806_v14, %v870_v46 }
 0x20f   :  { %v1269_v50 = vpack.c.bf16 %v879_v45, %v876_v44 }
 0x210   :  { %v1264_v51 = vpack.c.bf16 %v871_v49, %v868_v48 }
 0x211   :  { %1317 = vst [vmem:[%s1892_s4 + $0x38] sm:$0xff] %v1269_v50  }
 0x212   :  { %1316 = vst [vmem:[%s1892_s4 + $0x30] sm:$0xff] %v1264_v51  }
 0x21a   :  { %v1496_v52 = vpop.f32.mrb[32].mxu1 }
 0x21b   :  { %v883_v53 = vpop.f32.mrb[33].mxu1  ;;  %v892_v55 = vadd.f32 %v1496_v52, %v1806_v14 }
 0x21c   :  { %v1497_v54 = vpop.f32.mrb[34].mxu1  ;;  %v884_v58 = vadd.f32 %v1806_v14, %v883_v53 }
 0x21d   :  { %v895_v56 = vadd.f32 %v1497_v54, %v1806_v14  ;;  %v886_v57 = vpop.f32.mrb[35].mxu1 }
 0x21e   :  { %v887_v59 = vadd.f32 %v1806_v14, %v886_v57 }
 0x21f   :  { %v1279_v60 = vpack.c.bf16 %v895_v56, %v892_v55 }
 0x220   :  { %v1274_v61 = vpack.c.bf16 %v887_v59, %v884_v58 }
 0x221   :  { %1319 = vst [vmem:[%s1892_s4 + $0x48] sm:$0xff] %v1279_v60  }
 0x222   :  { %1318 = vst [vmem:[%s1892_s4 + $0x40] sm:$0xff] %v1274_v61  }
 0x22a   :  { %v1500_v62 = vpop.f32.mrb[36].mxu1 }
 0x22b   :  { %v899_v63 = vpop.f32.mrb[37].mxu1  ;;  %v908_v2 = vadd.f32 %v1500_v62, %v1806_v14 }
 0x22c   :  { %v1501_v0 = vpop.f32.mrb[38].mxu1  ;;  %v900_v5 = vadd.f32 %v1806_v14, %v899_v63 }
 0x22d   :  { %v911_v3 = vadd.f32 %v1501_v0, %v1806_v14  ;;  %v902_v4 = vpop.f32.mrb[39].mxu1 }
 0x22e   :  { %v903_v6 = vadd.f32 %v1806_v14, %v902_v4 }
 0x22f   :  { %v1289_v7 = vpack.c.bf16 %v911_v3, %v908_v2 }
 0x230   :  { %v1284_v8 = vpack.c.bf16 %v903_v6, %v900_v5 }
 0x231   :  { %1321 = vst [vmem:[%s1892_s4 + $0x58] sm:$0xff] %v1289_v7  }
 0x232   :  { %1320 = vst [vmem:[%s1892_s4 + $0x50] sm:$0xff] %v1284_v8   ;;  %v1504_v9 = vpop.f32.mrb[40].mxu1 }
 0x233   :  { %v915_v10 = vpop.f32.mrb[41].mxu1  ;;  %v924_v13 = vadd.f32 %v1504_v9, %v1806_v14 }
 0x234   :  { %v1505_v12 = vpop.f32.mrb[42].mxu1  ;;  %v916_v17 = vadd.f32 %v1806_v14, %v915_v10 }
 0x235   :  { %v927_v15 = vadd.f32 %v1505_v12, %v1806_v14  ;;  %v918_v16 = vpop.f32.mrb[43].mxu1 }
 0x236   :  { %v919_v18 = vadd.f32 %v1806_v14, %v918_v16 }
 0x237   :  { %v1299_v19 = vpack.c.bf16 %v927_v15, %v924_v13 }
 0x238   :  { %v1294_v11 = vpack.c.bf16 %v919_v18, %v916_v17 }
 0x239   :  { %1323 = vst [vmem:[%s1892_s4 + $0x68] sm:$0xff] %v1299_v19  }
 0x23a   :  { %1322 = vst [vmem:[%s1892_s4 + $0x60] sm:$0xff] %v1294_v11   ;;  %v1508_v29 = vpop.f32.mrb[44].mxu1 }
 0x23b   :  { %v931_v47 = vpop.f32.mrb[45].mxu1  ;;  %v940_v1 = vadd.f32 %v1508_v29, %v1806_v14 }
 0x23c   :  { %v1509_v20 = vpop.f32.mrb[46].mxu1  ;;  %v932_v23 = vadd.f32 %v1806_v14, %v931_v47 }
 0x23d   :  { %v943_v21 = vadd.f32 %v1509_v20, %v1806_v14  ;;  %v934_v22 = vpop.f32.mrb[47].mxu1 }
 0x23e   :  { %v935_v24 = vadd.f32 %v1806_v14, %v934_v22 }
 0x23f   :  { %v1309_v25 = vpack.c.bf16 %v943_v21, %v940_v1 }
 0x240   :  { %v1304_v26 = vpack.c.bf16 %v935_v24, %v932_v23 }
 0x241   :  { %1325 = vst [vmem:[%s1892_s4 + $0x78] sm:$0xff] %v1309_v25  }
 0x242   :  { %1324 = vst [vmem:[%s1892_s4 + $0x70] sm:$0xff] %v1304_v26  }

// kernel: gcn_net_forward.5
= control target key start
LH: loop header
LB: loop body
LE: loop exit
PB: predicated region body
PF: predicated region fallthrough
CT: control target
= control target key end

     0   :  { %v660_v48 = vlaneseq  ;;  %s1997_s1 = inlined_call_operand.vmem [shape: bf16[256,128], index: 1, kind: input, shape index: {}]   ;;  %s1998_s0 = inlined_call_operand.vmem [shape: bf16[256,256], index: 0, kind: input, shape index: {}]   ;;  %s1999_s2 = inlined_call_operand.vmem [shape: f32[256,128], index: 2, kind: output, shape index: {}]  }
   0x1   :  { %v1227_v0 = vld [vmem:[%s1997_s1 + $0x40] sm:$0xff]   ;;  %v1229_v2 = vld [vmem:[%s1997_s1 + $0x48] sm:$0xff]   ;;  %v1231_v4 = vld [vmem:[%s1997_s1 + $0x50] sm:$0xff]  }
   0x2   :  { %v1228_v1 = vld [vmem:[%s1997_s1] sm:$0xff]   ;;  %1099 = vmatprep.subr.bf16.mxu0 %v1227_v0  ;;  %1211 = vmatprep.subr.bf16.mxu1 %v1227_v0  ;;  %v1230_v3 = vld [vmem:[%s1997_s1 + $0x8] sm:$0xff]   ;;  %v1232_v5 = vld [vmem:[%s1997_s1 + $0x10] sm:$0xff]   ;;  %v1578_v49 = vand.u32 127, %v660_v48 }
   0x3   :  { %1100 = vmatpush3.bf16.msra.mxu0 %v1228_v1  ;;  %1219 = vmatpush3.bf16.msra.mxu1 %v1228_v1  ;;  %v1233_v6 = vld [vmem:[%s1997_s1 + $0x58] sm:$0xff]   ;;  %v1235_v8 = vld [vmem:[%s1997_s1 + $0x60] sm:$0xff]   ;;  %v1237_v10 = vld [vmem:[%s1997_s1 + $0x68] sm:$0xff]  }
   0x4   :  { %1101 = vmatprep.subr.bf16.mxu0 %v1229_v2  ;;  %1212 = vmatprep.subr.bf16.mxu1 %v1229_v2  ;;  %v1234_v7 = vld [vmem:[%s1997_s1 + $0x18] sm:$0xff]   ;;  %v1236_v9 = vld [vmem:[%s1997_s1 + $0x20] sm:$0xff]   ;;  %v1238_v13 = vld [vmem:[%s1997_s1 + $0x28] sm:$0xff]   ;;  %vm662_vm0 = vcmp.lt.s32.totalorder %v1578_v49, 2 }
   0x5   :  { %v1245_v11 = vld [vmem:[%s1998_s0 + $0x4] ss:$8 sps:$4 sm:$0xff]   ;;  %v1239_v14 = vld [vmem:[%s1997_s1 + $0x70] sm:$0xff]   ;;  %v1241_v16 = vld [vmem:[%s1997_s1 + $0x78] sm:$0xff]  }
   0x6   :  { %v1248_v12 = vld [vmem:[%s1998_s0 + $0x84] ss:$8 sps:$4 sm:$0xff]   ;;  %432 = vmatprep.mubr.bf16.mxu0 %v1245_v11  ;;  %v1240_v15 = vld [vmem:[%s1997_s1 + $0x30] sm:$0xff]   ;;  %v1242_v17 = vld [vmem:[%s1997_s1 + $0x38] sm:$0xff]  }
   0x7   :  { %1102 = vmatpush3.bf16.msra.mxu0 %v1230_v3  ;;  %1220 = vmatpush3.bf16.msra.mxu1 %v1230_v3  ;;  %v1243_v18 = vld [vmem:[%s1998_s0] ss:$8 sps:$4 sm:$0xff]   ;;  %v1249_v20 = vld [vmem:[%s1998_s0 + $0x14] ss:$8 sps:$4 sm:$0xff]   ;;  %v1251_v22 = vld [vmem:[%s1998_s0 + $0x10] ss:$8 sps:$4 sm:$0xff]  }
   0x8   :  { %1103 = vmatprep.subr.bf16.mxu0 %v1231_v4  ;;  %1213 = vmatprep.subr.bf16.mxu1 %v1231_v4  ;;  %v1246_v19 = vld [vmem:[%s1998_s0 + $0x80] ss:$8 sps:$4 sm:$0xff]   ;;  %v1252_v21 = vld [vmem:[%s1998_s0 + $0x94] ss:$8 sps:$4 sm:$0xff]   ;;  %v1254_v23 = vld [vmem:[%s1998_s0 + $0x90] ss:$8 sps:$4 sm:$0xff]  }
   0x9   :  { %496 = vmatprep.mubr.bf16.mxu1 %v1248_v12  ;;  %v1255_v24 = vld [vmem:[%s1998_s0 + $0x24] ss:$8 sps:$4 sm:$0xff]   ;;  %v1257_v26 = vld [vmem:[%s1998_s0 + $0x20] ss:$8 sps:$4 sm:$0xff]   ;;  %v1261_v28 = vld [vmem:[%s1998_s0 + $0x34] ss:$8 sps:$4 sm:$0xff]  }
   0xa   :  { %v1258_v25 = vld [vmem:[%s1998_s0 + $0xa4] ss:$8 sps:$4 sm:$0xff]   ;;  %v1260_v27 = vld [vmem:[%s1998_s0 + $0xa0] ss:$8 sps:$4 sm:$0xff]   ;;  %v1264_v29 = vld [vmem:[%s1998_s0 + $0xb4] ss:$8 sps:$4 sm:$0xff]  }
   0xb   :  { %1104 = vmatpush3.bf16.msra.mxu0 %v1232_v5  ;;  %1221 = vmatpush3.bf16.msra.mxu1 %v1232_v5  ;;  %v1263_v30 = vld [vmem:[%s1998_s0 + $0x30] ss:$8 sps:$4 sm:$0xff]   ;;  %v1267_v32 = vld [vmem:[%s1998_s0 + $0x44] ss:$8 sps:$4 sm:$0xff]   ;;  %v1269_v34 = vld [vmem:[%s1998_s0 + $0x40] ss:$8 sps:$4 sm:$0xff]  }
   0xc   :  { %1105 = vmatprep.subr.bf16.mxu0 %v1233_v6  ;;  %1214 = vmatprep.subr.bf16.mxu1 %v1233_v6  ;;  %v1266_v31 = vld [vmem:[%s1998_s0 + $0xb0] ss:$8 sps:$4 sm:$0xff]   ;;  %v1270_v33 = vld [vmem:[%s1998_s0 + $0xc4] ss:$8 sps:$4 sm:$0xff]   ;;  %v1272_v35 = vld [vmem:[%s1998_s0 + $0xc0] ss:$8 sps:$4 sm:$0xff]  }
   0xd   :  { %v1273_v36 = vld [vmem:[%s1998_s0 + $0x54] ss:$8 sps:$4 sm:$0xff]   ;;  %v1275_v38 = vld [vmem:[%s1998_s0 + $0x50] ss:$8 sps:$4 sm:$0xff]   ;;  %v1279_v40 = vld [vmem:[%s1998_s0 + $0x64] ss:$8 sps:$4 sm:$0xff]  }
   0xe   :  { %v1276_v37 = vld [vmem:[%s1998_s0 + $0xd4] ss:$8 sps:$4 sm:$0xff]   ;;  %v1278_v39 = vld [vmem:[%s1998_s0 + $0xd0] ss:$8 sps:$4 sm:$0xff]   ;;  %v1282_v41 = vld [vmem:[%s1998_s0 + $0xe4] ss:$8 sps:$4 sm:$0xff]  }
   0xf   :  { %1106 = vmatpush3.bf16.msra.mxu0 %v1234_v7  ;;  %1222 = vmatpush3.bf16.msra.mxu1 %v1234_v7  ;;  %v1281_v42 = vld [vmem:[%s1998_s0 + $0x60] ss:$8 sps:$4 sm:$0xff]   ;;  %v1285_v44 = vld [vmem:[%s1998_s0 + $0x74] ss:$8 sps:$4 sm:$0xff]   ;;  %v1287_v46 = vld [vmem:[%s1998_s0 + $0x70] ss:$8 sps:$4 sm:$0xff]  }
  0x10   :  { %1107 = vmatprep.subr.bf16.mxu0 %v1235_v8  ;;  %1215 = vmatprep.subr.bf16.mxu1 %v1235_v8  ;;  %v1284_v43 = vld [vmem:[%s1998_s0 + $0xe0] ss:$8 sps:$4 sm:$0xff]   ;;  %v1288_v45 = vld [vmem:[%s1998_s0 + $0xf4] ss:$8 sps:$4 sm:$0xff]   ;;  %v1290_v47 = vld [vmem:[%s1998_s0 + $0xf0] ss:$8 sps:$4 sm:$0xff]  }
  0x13   :  { %1108 = vmatpush3.bf16.msra.mxu0 %v1236_v9  ;;  %1223 = vmatpush3.bf16.msra.mxu1 %v1236_v9 }
  0x14   :  { %1109 = vmatprep.subr.bf16.mxu0 %v1237_v10  ;;  %1216 = vmatprep.subr.bf16.mxu1 %v1237_v10 }
  0x17   :  { %1110 = vmatpush3.bf16.msra.mxu0 %v1238_v13  ;;  %1224 = vmatpush3.bf16.msra.mxu1 %v1238_v13 }
  0x18   :  { %1111 = vmatprep.subr.bf16.mxu0 %v1239_v14  ;;  %1217 = vmatprep.subr.bf16.mxu1 %v1239_v14 }
  0x1b   :  { %1112 = vmatpush3.bf16.msra.mxu0 %v1240_v15  ;;  %1225 = vmatpush3.bf16.msra.mxu1 %v1240_v15 }
  0x1c   :  { %1113 = vmatprep.subr.bf16.mxu0 %v1241_v16  ;;  %1218 = vmatprep.subr.bf16.mxu1 %v1241_v16 }
  0x1f   :  { %1114 = vmatpush3.bf16.msra.mxu0 %v1242_v17  ;;  %1226 = vmatpush3.bf16.msra.mxu1 %v1242_v17 }
  0x22   :  { %433 = vmatmul.mubr.bf16.vlgmr.msra.gmra.mrb[0].mxu0 %v1243_v18  ;;  %497 = vmatmul.mubr.bf16.vlgmr.msra.gmra.mrb[0].mxu1 %v1246_v19 }
  0x23   :  { %440 = vmatprep.mubr.bf16.mxu0 %v1249_v20  ;;  %504 = vmatprep.mubr.bf16.mxu1 %v1252_v21 }
  0x2a   :  { %441 = vmatmul.mubr.bf16.gmra.mrb[4].mxu0 %v1251_v22  ;;  %505 = vmatmul.mubr.bf16.gmra.mrb[4].mxu1 %v1254_v23 }
  0x2b   :  { %448 = vmatprep.mubr.bf16.mxu0 %v1255_v24  ;;  %512 = vmatprep.mubr.bf16.mxu1 %v1258_v25 }
  0x32   :  { %449 = vmatmul.mubr.bf16.gmra.mrb[8].mxu0 %v1257_v26  ;;  %513 = vmatmul.mubr.bf16.gmra.mrb[8].mxu1 %v1260_v27 }
  0x33   :  { %456 = vmatprep.mubr.bf16.mxu0 %v1261_v28  ;;  %520 = vmatprep.mubr.bf16.mxu1 %v1264_v29 }
  0x3a   :  { %457 = vmatmul.mubr.bf16.gmra.mrb[12].mxu0 %v1263_v30  ;;  %521 = vmatmul.mubr.bf16.gmra.mrb[12].mxu1 %v1266_v31 }
  0x3b   :  { %464 = vmatprep.mubr.bf16.mxu0 %v1267_v32  ;;  %528 = vmatprep.mubr.bf16.mxu1 %v1270_v33 }
  0x42   :  { %465 = vmatmul.mubr.bf16.gmra.mrb[16].mxu0 %v1269_v34  ;;  %529 = vmatmul.mubr.bf16.gmra.mrb[16].mxu1 %v1272_v35 }
  0x43   :  { %472 = vmatprep.mubr.bf16.mxu0 %v1273_v36  ;;  %536 = vmatprep.mubr.bf16.mxu1 %v1276_v37 }
  0x4a   :  { %473 = vmatmul.mubr.bf16.gmra.mrb[20].mxu0 %v1275_v38  ;;  %537 = vmatmul.mubr.bf16.gmra.mrb[20].mxu1 %v1278_v39 }
  0x4b   :  { %480 = vmatprep.mubr.bf16.mxu0 %v1279_v40  ;;  %544 = vmatprep.mubr.bf16.mxu1 %v1282_v41 }
  0x52   :  { %481 = vmatmul.mubr.bf16.gmra.mrb[24].mxu0 %v1281_v42  ;;  %545 = vmatmul.mubr.bf16.gmra.mrb[24].mxu1 %v1284_v43 }
  0x53   :  { %488 = vmatprep.mubr.bf16.mxu0 %v1285_v44  ;;  %552 = vmatprep.mubr.bf16.mxu1 %v1288_v45 }
  0x5a   :  { %489 = vmatmul.mubr.bf16.gmra.mrb[28].mxu0 %v1287_v46  ;;  %553 = vmatmul.mubr.bf16.gmra.mrb[28].mxu1 %v1290_v47 }
  0xf5   :  { %v1115_v50 = vpop.f32.mrb[0].mxu0  ;;  %v1163_v51 = vpop.f32.mrb[0].mxu1 }
  0xf6   :  { %v1116_v52 = vpop.f32.mrb[1].mxu0  ;;  %v1164_v53 = vpop.f32.mrb[1].mxu1 }
  0xf7   :  { %v1117_v54 = vadd.f32 %v1116_v52, %v1115_v50  ;;  %v1165_v55 = vadd.f32 %v1164_v53, %v1163_v51  ;;  %v1118_v56 = vpop.f32.mrb[2].mxu0  ;;  %v1166_v57 = vpop.f32.mrb[2].mxu1 }
  0xf8   :  { %v1119_v58 = vpop.f32.mrb[3].mxu0  ;;  %v1167_v59 = vpop.f32.mrb[3].mxu1 }
  0xf9   :  { %v1120_v60 = vadd.f32 %v1119_v58, %v1118_v56  ;;  %v1168_v61 = vadd.f32 %v1167_v59, %v1166_v57  ;;  %v1583_v62 = vsel %vm662_vm0, %v1117_v54, -1e+30  ;;  %v1592_v0 = vsel %vm662_vm0, %v1165_v55, -1e+30 }
  0xfa   :  { %695 = vmax.xlane.f32.xlu0 %v1583_v62 }
  0xfb   :  { %v1588_v63 = vsel %vm662_vm0, %v1168_v61, -1e+30  ;;  %v1602_v13 = vsel %vm662_vm0, %v1120_v60, -1e+30 }
  0xfc   :  { %729 = vmax.xlane.f32.xlu1 %v1588_v63 }
  0xfd   :  { %v1121_v1 = vpop.f32.mrb[4].mxu0  ;;  %v1169_v2 = vpop.f32.mrb[4].mxu1 }
  0xfe   :  { %v1122_v3 = vpop.f32.mrb[5].mxu0  ;;  %727 = vmax.xlane.f32.xlu0 %v1592_v0  ;;  %v1170_v4 = vpop.f32.mrb[5].mxu1 }
  0xff   :  { %v1123_v5 = vadd.f32 %v1122_v3, %v1121_v1  ;;  %v1124_v6 = vpop.f32.mrb[6].mxu0  ;;  %v1171_v7 = vadd.f32 %v1170_v4, %v1169_v2  ;;  %v1172_v8 = vpop.f32.mrb[6].mxu1 }
 0x100   :  { %v1125_v9 = vpop.f32.mrb[7].mxu0  ;;  %v1173_v10 = vpop.f32.mrb[7].mxu1 }
 0x101   :  { %v1126_v11 = vadd.f32 %v1125_v9, %v1124_v6  ;;  %v1598_v12 = vsel %vm662_vm0, %v1123_v5, -1e+30  ;;  %v1174_v14 = vadd.f32 %v1173_v10, %v1172_v8  ;;  %v1612_v16 = vsel %vm662_vm0, %v1171_v7, -1e+30 }
 0x102   :  { %699 = vmax.xlane.f32.xlu1 %v1598_v12  ;;  %697 = vmax.xlane.f32.xlu0 %v1602_v13 }
 0x103   :  { %v1608_v15 = vsel %vm662_vm0, %v1126_v11, -1e+30  ;;  %v1618_v24 = vsel %vm662_vm0, %v1174_v14, -1e+30 }
 0x105   :  { %v1127_v17 = vpop.f32.mrb[8].mxu0  ;;  %v1175_v18 = vpop.f32.mrb[8].mxu1 }
 0x106   :  { %v1128_v19 = vpop.f32.mrb[9].mxu0  ;;  %701 = vmax.xlane.f32.xlu1 %v1608_v15  ;;  %731 = vmax.xlane.f32.xlu0 %v1612_v16  ;;  %v1176_v20 = vpop.f32.mrb[9].mxu1 }
 0x107   :  { %v1129_v21 = vadd.f32 %v1128_v19, %v1127_v17  ;;  %v1130_v22 = vpop.f32.mrb[10].mxu0  ;;  %v1177_v23 = vadd.f32 %v1176_v20, %v1175_v18  ;;  %v1178_v25 = vpop.f32.mrb[10].mxu1 }
 0x108   :  { %v1131_v26 = vpop.f32.mrb[11].mxu0  ;;  %v1179_v27 = vpop.f32.mrb[11].mxu1 }
 0x109   :  { %v1132_v28 = vadd.f32 %v1131_v26, %v1130_v22  ;;  %v1622_v29 = vsel %vm662_vm0, %v1129_v21, -1e+30  ;;  %v1180_v30 = vadd.f32 %v1179_v27, %v1178_v25  ;;  %v1632_v32 = vsel %vm662_vm0, %v1177_v23, -1e+30 }
 0x10a   :  { %733 = vmax.xlane.f32.xlu1 %v1618_v24  ;;  %703 = vmax.xlane.f32.xlu0 %v1622_v29 }
 0x10b   :  { %v1628_v31 = vsel %vm662_vm0, %v1132_v28, -1e+30  ;;  %v1638_v40 = vsel %vm662_vm0, %v1180_v30, -1e+30 }
 0x10d   :  { %v1133_v33 = vpop.f32.mrb[12].mxu0  ;;  %v1181_v34 = vpop.f32.mrb[12].mxu1 }
 0x10e   :  { %v1134_v35 = vpop.f32.mrb[13].mxu0  ;;  %705 = vmax.xlane.f32.xlu1 %v1628_v31  ;;  %735 = vmax.xlane.f32.xlu0 %v1632_v32  ;;  %v1182_v36 = vpop.f32.mrb[13].mxu1 }
 0x10f   :  { %v1135_v37 = vadd.f32 %v1134_v35, %v1133_v33  ;;  %v1136_v38 = vpop.f32.mrb[14].mxu0  ;;  %v1183_v39 = vadd.f32 %v1182_v36, %v1181_v34  ;;  %v1184_v41 = vpop.f32.mrb[14].mxu1 }
 0x110   :  { %v1137_v42 = vpop.f32.mrb[15].mxu0  ;;  %v1185_v43 = vpop.f32.mrb[15].mxu1 }
 0x111   :  { %v1138_v44 = vadd.f32 %v1137_v42, %v1136_v38  ;;  %v1642_v45 = vsel %vm662_vm0, %v1135_v37, -1e+30  ;;  %v1186_v46 = vadd.f32 %v1185_v43, %v1184_v41  ;;  %v1652_v48 = vsel %vm662_vm0, %v1183_v39, -1e+30 }
 0x112   :  { %737 = vmax.xlane.f32.xlu1 %v1638_v40  ;;  %707 = vmax.xlane.f32.xlu0 %v1642_v45 }
 0x113   :  { %v1648_v47 = vsel %vm662_vm0, %v1138_v44, -1e+30  ;;  %v1658_v57 = vsel %vm662_vm0, %v1186_v46, -1e+30 }
 0x115   :  { %v1139_v50 = vpop.f32.mrb[16].mxu0  ;;  %v1187_v51 = vpop.f32.mrb[16].mxu1 }
 0x116   :  { %v1140_v52 = vpop.f32.mrb[17].mxu0  ;;  %709 = vmax.xlane.f32.xlu1 %v1648_v47  ;;  %739 = vmax.xlane.f32.xlu0 %v1652_v48  ;;  %v1188_v53 = vpop.f32.mrb[17].mxu1 }
 0x117   :  { %v1141_v54 = vadd.f32 %v1140_v52, %v1139_v50  ;;  %v1142_v55 = vpop.f32.mrb[18].mxu0  ;;  %v1189_v56 = vadd.f32 %v1188_v53, %v1187_v51  ;;  %v1190_v58 = vpop.f32.mrb[18].mxu1 }
 0x118   :  { %v1143_v59 = vpop.f32.mrb[19].mxu0  ;;  %v1191_v60 = vpop.f32.mrb[19].mxu1 }
 0x119   :  { %v1144_v61 = vadd.f32 %v1143_v59, %v1142_v55  ;;  %v1662_v1 = vsel %vm662_vm0, %v1141_v54, -1e+30  ;;  %v1192_v2 = vadd.f32 %v1191_v60, %v1190_v58  ;;  %v1672_v4 = vsel %vm662_vm0, %v1189_v56, -1e+30 }
 0x11a   :  { %741 = vmax.xlane.f32.xlu1 %v1658_v57  ;;  %711 = vmax.xlane.f32.xlu0 %v1662_v1 }
 0x11b   :  { %v1668_v3 = vsel %vm662_vm0, %v1144_v61, -1e+30  ;;  %v1678_v14 = vsel %vm662_vm0, %v1192_v2, -1e+30 }
 0x11d   :  { %v1145_v5 = vpop.f32.mrb[20].mxu0  ;;  %v1193_v6 = vpop.f32.mrb[20].mxu1 }
 0x11e   :  { %v1146_v7 = vpop.f32.mrb[21].mxu0  ;;  %713 = vmax.xlane.f32.xlu1 %v1668_v3  ;;  %743 = vmax.xlane.f32.xlu0 %v1672_v4  ;;  %v1194_v8 = vpop.f32.mrb[21].mxu1 }
 0x11f   :  { %v1147_v9 = vadd.f32 %v1146_v7, %v1145_v5  ;;  %v1148_v10 = vpop.f32.mrb[22].mxu0  ;;  %v1195_v11 = vadd.f32 %v1194_v8, %v1193_v6  ;;  %v1196_v17 = vpop.f32.mrb[22].mxu1 }
 0x120   :  { %v1149_v18 = vpop.f32.mrb[23].mxu0  ;;  %v1197_v19 = vpop.f32.mrb[23].mxu1 }
 0x121   :  { %v1150_v20 = vadd.f32 %v1149_v18, %v1148_v10  ;;  %v1682_v21 = vsel %vm662_vm0, %v1147_v9, -1e+30  ;;  %v1198_v22 = vadd.f32 %v1197_v19, %v1196_v17  ;;  %v1692_v25 = vsel %vm662_vm0, %v1195_v11, -1e+30 }
 0x122   :  { %745 = vmax.xlane.f32.xlu1 %v1678_v14  ;;  %715 = vmax.xlane.f32.xlu0 %v1682_v21 }
 0x123   :  { %v1688_v23 = vsel %vm662_vm0, %v1150_v20, -1e+30  ;;  %v1698_v36 = vsel %vm662_vm0, %v1198_v22, -1e+30 }
 0x125   :  { %v1151_v26 = vpop.f32.mrb[24].mxu0  ;;  %v1199_v27 = vpop.f32.mrb[24].mxu1 }
 0x126   :  { %v1152_v28 = vpop.f32.mrb[25].mxu0  ;;  %717 = vmax.xlane.f32.xlu1 %v1688_v23  ;;  %747 = vmax.xlane.f32.xlu0 %v1692_v25  ;;  %v1200_v30 = vpop.f32.mrb[25].mxu1 }
 0x127   :  { %v1153_v33 = vadd.f32 %v1152_v28, %v1151_v26  ;;  %v1154_v34 = vpop.f32.mrb[26].mxu0  ;;  %v1201_v35 = vadd.f32 %v1200_v30, %v1199_v27  ;;  %v1202_v37 = vpop.f32.mrb[26].mxu1 }
 0x128   :  { %v1155_v38 = vpop.f32.mrb[27].mxu0  ;;  %v1203_v39 = vpop.f32.mrb[27].mxu1 }
 0x129   :  { %v1156_v41 = vadd.f32 %v1155_v38, %v1154_v34  ;;  %v1702_v42 = vsel %vm662_vm0, %v1153_v33, -1e+30  ;;  %v1204_v43 = vadd.f32 %v1203_v39, %v1202_v37  ;;  %v1712_v46 = vsel %vm662_vm0, %v1201_v35, -1e+30 }
 0x12a   :  { %749 = vmax.xlane.f32.xlu1 %v1698_v36  ;;  %719 = vmax.xlane.f32.xlu0 %v1702_v42 }
 0x12b   :  { %v1708_v44 = vsel %vm662_vm0, %v1156_v41, -1e+30  ;;  %v1718_v58 = vsel %vm662_vm0, %v1204_v43, -1e+30 }
 0x12d   :  { %v1157_v50 = vpop.f32.mrb[28].mxu0  ;;  %v1205_v51 = vpop.f32.mrb[28].mxu1 }
 0x12e   :  { %v1158_v52 = vpop.f32.mrb[29].mxu0  ;;  %721 = vmax.xlane.f32.xlu1 %v1708_v44  ;;  %751 = vmax.xlane.f32.xlu0 %v1712_v46  ;;  %v1206_v53 = vpop.f32.mrb[29].mxu1 }
 0x12f   :  { %v1159_v54 = vadd.f32 %v1158_v52, %v1157_v50  ;;  %v1160_v55 = vpop.f32.mrb[30].mxu0  ;;  %v1207_v56 = vadd.f32 %v1206_v53, %v1205_v51  ;;  %v1208_v59 = vpop.f32.mrb[30].mxu1 }
 0x130   :  { %v1161_v60 = vpop.f32.mrb[31].mxu0  ;;  %v1209_v61 = vpop.f32.mrb[31].mxu1 }
 0x131   :  { %v1162_v2 = vadd.f32 %v1161_v60, %v1160_v55  ;;  %v1722_v5 = vsel %vm662_vm0, %v1159_v54, -1e+30  ;;  %v1210_v6 = vadd.f32 %v1209_v61, %v1208_v59  ;;  %v1732_v8 = vsel %vm662_vm0, %v1207_v56, -1e+30 }
 0x132   :  { %753 = vmax.xlane.f32.xlu1 %v1718_v58  ;;  %723 = vmax.xlane.f32.xlu0 %v1722_v5 }
 0x133   :  { %v1728_v7 = vsel %vm662_vm0, %v1162_v2, -1e+30  ;;  %v1736_v9 = vsel %vm662_vm0, %v1210_v6, -1e+30 }
 0x136   :  { %725 = vmax.xlane.f32.xlu1 %v1728_v7  ;;  %755 = vmax.xlane.f32.xlu0 %v1732_v8 }
 0x13a   :  { %757 = vmax.xlane.f32.xlu1 %v1736_v9 }
 0x187   :  { %v696_v10 = vpop.xlane.xlu0 %695 }
 0x188   :  { %v1742_v11 = vsub.f32 %v1583_v62, %v696_v10 }
 0x189   :  { %v730_v18 = vpop.xlane.xlu1 %729 }
 0x18a   :  { %v791_v17 = vmul.f32 1.442695, %v1742_v11  ;;  %v1750_v27 = vsub.f32 %v1588_v63, %v730_v18 }
 0x18b   :  { %v728_v19 = vpop.xlane.xlu0 %727 }
 0x18c   :  { %1291 = vpow2.f32 %v791_v17  ;;  %v1746_v20 = vsub.f32 %v1592_v0, %v728_v19  ;;  %v825_v35 = vmul.f32 1.442695, %v1750_v27 }
 0x18e   :  { %v823_v49 = vmul.f32 1.442695, %v1746_v20 }
 0x18f   :  { %v700_v22 = vpop.xlane.xlu1 %699  ;;  %v698_v26 = vpop.xlane.xlu0 %697 }
 0x190   :  { %1293 = vpow2.f32 %v823_v49  ;;  %v1753_v28 = vsub.f32 %v1598_v12, %v700_v22  ;;  %v1756_v62 = vsub.f32 %v1602_v13, %v698_v26 }
 0x192   :  { %v795_v30 = vmul.f32 1.442695, %v1753_v28  ;;  %v793_v33 = vmul.f32 1.442695, %v1756_v62 }
 0x193   :  { %v702_v0 = vpop.xlane.xlu1 %701  ;;  %v732_v34 = vpop.xlane.xlu0 %731 }
 0x194   :  { %1295 = vpow2.f32 %v795_v30  ;;  %v1762_v37 = vsub.f32 %v1608_v15, %v702_v0  ;;  %v1765_v63 = vsub.f32 %v1612_v16, %v732_v34 }
 0x195   :  { %1297 = vpow2.f32 %v793_v33 }
 0x196   :  { %v1292_v12 = vpop.eup %1291  ;;  %v827_v13 = vmul.f32 1.442695, %v1765_v63  ;;  %1299 = vpow2.f32 %v825_v35  ;;  %v797_v41 = vmul.f32 1.442695, %v1762_v37 }
 0x197   :  { %v734_v38 = vpop.xlane.xlu1 %733  ;;  %855 = vadd.xlane.f32.xlu0 %v1292_v12  ;;  %v704_v39 = vpop.xlane.xlu0 %703 }
 0x198   :  { %v1770_v43 = vsub.f32 %v1618_v24, %v734_v38  ;;  %v1773_v50 = vsub.f32 %v1622_v29, %v704_v39  ;;  %1301 = vpow2.f32 %v827_v13 }
 0x199   :  { %1303 = vpow2.f32 %v797_v41 }
 0x19a   :  { %v1294_v15 = vpop.eup %1293  ;;  %v799_v16 = vmul.f32 1.442695, %v1773_v50  ;;  %v829_v53 = vmul.f32 1.442695, %v1770_v43 }
 0x19b   :  { %v706_v51 = vpop.xlane.xlu1 %705  ;;  %887 = vadd.xlane.f32.xlu0 %v1294_v15  ;;  %v736_v52 = vpop.xlane.xlu0 %735 }
 0x19c   :  { %v1778_v54 = vsub.f32 %v1628_v31, %v706_v51  ;;  %v1781_v55 = vsub.f32 %v1632_v32, %v736_v52  ;;  %1305 = vpow2.f32 %v799_v16 }
 0x19d   :  { %1307 = vpow2.f32 %v829_v53 }
 0x19e   :  { %v1296_v24 = vpop.eup %1295  ;;  %v831_v29 = vmul.f32 1.442695, %v1781_v55  ;;  %v801_v61 = vmul.f32 1.442695, %v1778_v54 }
 0x19f   :  { %v1298_v56 = vpop.eup %1297  ;;  %v738_v59 = vpop.xlane.xlu1 %737  ;;  %859 = vadd.xlane.f32.xlu0 %v1296_v24 }
 0x1a0   :  { %v708_v60 = vpop.xlane.xlu0 %707  ;;  %v1786_v2 = vsub.f32 %v1638_v40, %v738_v59  ;;  %857 = vadd.xlane.f32.xlu1 %v1298_v56  ;;  %1309 = vpow2.f32 %v831_v29  ;;  %v1300_v32 = vpop.eup %1299 }
 0x1a1   :  { %v1789_v31 = vsub.f32 %v1642_v45, %v708_v60  ;;  %1311 = vpow2.f32 %v801_v61 }
 0x1a2   :  { %v1302_v10 = vpop.eup %1301  ;;  %v833_v19 = vmul.f32 1.442695, %v1786_v2 }
 0x1a3   :  { %v803_v6 = vmul.f32 1.442695, %v1789_v31  ;;  %v710_v17 = vpop.xlane.xlu1 %709  ;;  %891 = vadd.xlane.f32.xlu0 %v1302_v10  ;;  %v1304_v45 = vpop.eup %1303 }
 0x1a4   :  { %v740_v18 = vpop.xlane.xlu0 %739  ;;  %v1794_v49 = vsub.f32 %v1648_v47, %v710_v17  ;;  %889 = vadd.xlane.f32.xlu1 %v1300_v32 }
 0x1a5   :  { %v1797_v40 = vsub.f32 %v1652_v48, %v740_v18  ;;  %1313 = vpow2.f32 %v803_v6 }
 0x1a6   :  { %v1306_v26 = vpop.eup %1305  ;;  %1315 = vpow2.f32 %v833_v19  ;;  %v805_v0 = vmul.f32 1.442695, %v1794_v49 }
 0x1a7   :  { %v835_v22 = vmul.f32 1.442695, %v1797_v40  ;;  %v742_v30 = vpop.xlane.xlu1 %741  ;;  %863 = vadd.xlane.f32.xlu0 %v1306_v26  ;;  %v1308_v48 = vpop.eup %1307 }
 0x1a8   :  { %v712_v33 = vpop.xlane.xlu0 %711  ;;  %v1802_v34 = vsub.f32 %v1658_v57, %v742_v30  ;;  %861 = vadd.xlane.f32.xlu1 %v1304_v45 }
 0x1a9   :  { %v1805_v47 = vsub.f32 %v1662_v1, %v712_v33  ;;  %1317 = vpow2.f32 %v835_v22 }
 0x1aa   :  { %v1310_v12 = vpop.eup %1309  ;;  %1319 = vpow2.f32 %v805_v0  ;;  %v837_v39 = vmul.f32 1.442695, %v1802_v34 }
 0x1ab   :  { %v807_v35 = vmul.f32 1.442695, %v1805_v47  ;;  %v714_v13 = vpop.xlane.xlu1 %713  ;;  %895 = vadd.xlane.f32.xlu0 %v1310_v12  ;;  %v1312_v1 = vpop.eup %1311 }
 0x1ac   :  { %v744_v38 = vpop.xlane.xlu0 %743  ;;  %v1810_v41 = vsub.f32 %v1668_v3, %v714_v13  ;;  %893 = vadd.xlane.f32.xlu1 %v1308_v48 }
 0x1ad   :  { %v1813_v57 = vsub.f32 %v1672_v4, %v744_v38  ;;  %1321 = vpow2.f32 %v807_v35 }
 0x1ae   :  { %1323 = vpow2.f32 %v837_v39  ;;  %v809_v53 = vmul.f32 1.442695, %v1810_v41 }
 0x1af   :  { %v839_v15 = vmul.f32 1.442695, %v1813_v57  ;;  %v1314_v16 = vpop.eup %1313  ;;  %v746_v51 = vpop.xlane.xlu1 %745 }
 0x1b0   :  { %v716_v52 = vpop.xlane.xlu0 %715  ;;  %v1818_v24 = vsub.f32 %v1678_v14, %v746_v51  ;;  %865 = vadd.xlane.f32.xlu1 %v1312_v1  ;;  %867 = vadd.xlane.f32.xlu0 %v1314_v16  ;;  %v1316_v4 = vpop.eup %1315 }
 0x1b1   :  { %v1821_v3 = vsub.f32 %v1682_v21, %v716_v52  ;;  %1325 = vpow2.f32 %v839_v15 }
 0x1b2   :  { %1327 = vpow2.f32 %v809_v53  ;;  %v841_v61 = vmul.f32 1.442695, %v1818_v24 }
 0x1b3   :  { %v811_v29 = vmul.f32 1.442695, %v1821_v3  ;;  %v1318_v56 = vpop.eup %1317  ;;  %v718_v59 = vpop.xlane.xlu1 %717 }
 0x1b4   :  { %v748_v60 = vpop.xlane.xlu0 %747  ;;  %v1826_v32 = vsub.f32 %v1688_v23, %v718_v59  ;;  %897 = vadd.xlane.f32.xlu1 %v1316_v4  ;;  %899 = vadd.xlane.f32.xlu0 %v1318_v56  ;;  %v1320_v21 = vpop.eup %1319 }
 0x1b5   :  { %v1829_v14 = vsub.f32 %v1692_v25, %v748_v60  ;;  %1329 = vpow2.f32 %v811_v29 }
 0x1b6   :  { %1331 = vpow2.f32 %v841_v61  ;;  %v813_v19 = vmul.f32 1.442695, %v1826_v32 }
 0x1b7   :  { %v843_v6 = vmul.f32 1.442695, %v1829_v14  ;;  %v1322_v10 = vpop.eup %1321  ;;  %v750_v17 = vpop.xlane.xlu1 %749 }
 0x1b8   :  { %v720_v18 = vpop.xlane.xlu0 %719  ;;  %v1834_v45 = vsub.f32 %v1698_v36, %v750_v17  ;;  %869 = vadd.xlane.f32.xlu1 %v1320_v21  ;;  %871 = vadd.xlane.f32.xlu0 %v1322_v10  ;;  %v1324_v25 = vpop.eup %1323 }
 0x1b9   :  { %v1837_v23 = vsub.f32 %v1702_v42, %v720_v18  ;;  %1333 = vpow2.f32 %v843_v6 }
 0x1ba   :  { %1335 = vpow2.f32 %v813_v19  ;;  %v845_v0 = vmul.f32 1.442695, %v1834_v45 }
 0x1bb   :  { %v815_v22 = vmul.f32 1.442695, %v1837_v23  ;;  %v1326_v26 = vpop.eup %1325  ;;  %v722_v30 = vpop.xlane.xlu1 %721 }
 0x1bc   :  { %v752_v33 = vpop.xlane.xlu0 %751  ;;  %v1842_v48 = vsub.f32 %v1708_v44, %v722_v30  ;;  %901 = vadd.xlane.f32.xlu1 %v1324_v25  ;;  %903 = vadd.xlane.f32.xlu0 %v1326_v26  ;;  %v1328_v42 = vpop.eup %1327 }
 0x1bd   :  { %v1845_v36 = vsub.f32 %v1712_v46, %v752_v33  ;;  %1337 = vpow2.f32 %v815_v22 }
 0x1be   :  { %1339 = vpow2.f32 %v845_v0  ;;  %v817_v39 = vmul.f32 1.442695, %v1842_v48 }
 0x1bf   :  { %v847_v35 = vmul.f32 1.442695, %v1845_v36  ;;  %v1330_v12 = vpop.eup %1329  ;;  %v754_v13 = vpop.xlane.xlu1 %753 }
 0x1c0   :  { %v724_v38 = vpop.xlane.xlu0 %723  ;;  %v1850_v1 = vsub.f32 %v1718_v58, %v754_v13  ;;  %873 = vadd.xlane.f32.xlu1 %v1328_v42  ;;  %875 = vadd.xlane.f32.xlu0 %v1330_v12  ;;  %v1332_v46 = vpop.eup %1331 }
 0x1c1   :  { %v1853_v44 = vsub.f32 %v1722_v5, %v724_v38  ;;  %1341 = vpow2.f32 %v847_v35 }
 0x1c2   :  { %1343 = vpow2.f32 %v817_v39  ;;  %v849_v53 = vmul.f32 1.442695, %v1850_v1 }
 0x1c3   :  { %v819_v15 = vmul.f32 1.442695, %v1853_v44  ;;  %v1334_v16 = vpop.eup %1333  ;;  %v726_v51 = vpop.xlane.xlu1 %725 }
 0x1c4   :  { %v756_v52 = vpop.xlane.xlu0 %755  ;;  %905 = vadd.xlane.f32.xlu1 %v1332_v46  ;;  %907 = vadd.xlane.f32.xlu0 %v1334_v16  ;;  %v1861_v4 = vsub.f32 %v1728_v7, %v726_v51  ;;  %v1336_v5 = vpop.eup %1335 }
 0x1c5   :  { %v1858_v58 = vsub.f32 %v1732_v8, %v756_v52  ;;  %1345 = vpow2.f32 %v819_v15 }
 0x1c6   :  { %1347 = vpow2.f32 %v849_v53  ;;  %v821_v60 = vmul.f32 1.442695, %v1861_v4 }
 0x1c7   :  { %v851_v29 = vmul.f32 1.442695, %v1858_v58  ;;  %v1338_v56 = vpop.eup %1337  ;;  %v758_v59 = vpop.xlane.xlu1 %757 }
 0x1c8   :  { %877 = vadd.xlane.f32.xlu1 %v1336_v5  ;;  %879 = vadd.xlane.f32.xlu0 %v1338_v56  ;;  %v1866_v61 = vsub.f32 %v1736_v9, %v758_v59  ;;  %v1340_v8 = vpop.eup %1339 }
 0x1c9   :  { %1349 = vpow2.f32 %v851_v29 }
 0x1ca   :  { %1351 = vpow2.f32 %v821_v60  ;;  %v853_v7 = vmul.f32 1.442695, %v1866_v61 }
 0x1cb   :  { %v1342_v21 = vpop.eup %1341 }
 0x1cc   :  { %909 = vadd.xlane.f32.xlu1 %v1340_v8  ;;  %911 = vadd.xlane.f32.xlu0 %v1342_v21  ;;  %v1344_v6 = vpop.eup %1343  ;;  %1353 = vpow2.f32 %v853_v7 }
 0x1cf   :  { %v1346_v10 = vpop.eup %1345 }
 0x1d0   :  { %881 = vadd.xlane.f32.xlu1 %v1344_v6  ;;  %883 = vadd.xlane.f32.xlu0 %v1346_v10  ;;  %v1348_v17 = vpop.eup %1347 }
 0x1d3   :  { %v1350_v18 = vpop.eup %1349 }
 0x1d4   :  { %913 = vadd.xlane.f32.xlu1 %v1348_v17  ;;  %915 = vadd.xlane.f32.xlu0 %v1350_v18  ;;  %v1352_v19 = vpop.eup %1351 }
 0x1d6   :  { %v1354_v9 = vpop.eup %1353 }
 0x1d8   :  { %885 = vadd.xlane.f32.xlu1 %v1352_v19 }
 0x1dc   :  { %917 = vadd.xlane.f32.xlu1 %v1354_v9 }
 0x224   :  { %v856_v25 = vpop.xlane.xlu0 %855 }
 0x225   :  { %1355 = vlog2.f32 %v856_v25 }
 0x228   :  { %v888_v22 = vpop.xlane.xlu0 %887 }
 0x229   :  { %1357 = vlog2.f32 %v888_v22 }
 0x22c   :  { %v860_v26 = vpop.xlane.xlu0 %859 }
 0x22d   :  { %v858_v30 = vpop.xlane.xlu1 %857  ;;  %1359 = vlog2.f32 %v860_v26 }
 0x22e   :  { %1361 = vlog2.f32 %v858_v30 }
 0x22f   :  { %v1356_v33 = vpop.eup %1355 }
 0x230   :  { %v920_v0 = vmul.f32 0.6931472, %v1356_v33  ;;  %v892_v35 = vpop.xlane.xlu0 %891 }
 0x231   :  { %v890_v42 = vpop.xlane.xlu1 %889 }
 0x232   :  { %v983_v12 = vsub.f32 %v1742_v11, %v920_v0  ;;  %1363 = vlog2.f32 %v890_v42 }
 0x233   :  { %v1358_v13 = vpop.eup %1357  ;;  %1365 = vlog2.f32 %v892_v35 }
 0x234   :  { %1015 = vst [vmem:[%s1999_s2] sm:$0xff] %v983_v12  ;;  %v952_v38 = vmul.f32 0.6931472, %v1358_v13  ;;  %v864_v46 = vpop.xlane.xlu0 %863 }
 0x235   :  { %v862_v39 = vpop.xlane.xlu1 %861 }
 0x236   :  { %v999_v15 = vsub.f32 %v1746_v20, %v952_v38  ;;  %1367 = vlog2.f32 %v862_v39 }
 0x237   :  { %v1360_v16 = vpop.eup %1359  ;;  %1369 = vlog2.f32 %v864_v46 }
 0x238   :  { %v1362_v51 = vpop.eup %1361  ;;  %1031 = vst [vmem:[%s1999_s2 + $0x80] sm:$0xff] %v999_v15  ;;  %v924_v11 = vmul.f32 0.6931472, %v1360_v16  ;;  %v896_v5 = vpop.xlane.xlu0 %895 }
 0x239   :  { %v922_v52 = vmul.f32 0.6931472, %v1362_v51  ;;  %v894_v53 = vpop.xlane.xlu1 %893 }
 0x23a   :  { %v985_v29 = vsub.f32 %v1753_v28, %v924_v11  ;;  %1371 = vlog2.f32 %v894_v53 }
 0x23b   :  { %v984_v56 = vsub.f32 %v1756_v62, %v922_v52  ;;  %1373 = vlog2.f32 %v896_v5 }
 0x23c   :  { %v1364_v59 = vpop.eup %1363  ;;  %1017 = vst [vmem:[%s1999_s2 + $0x10] sm:$0xff] %v985_v29 }
 0x23d   :  { %v1366_v20 = vpop.eup %1365  ;;  %1016 = vst [vmem:[%s1999_s2 + $0x8] sm:$0xff] %v984_v56  ;;  %v954_v60 = vmul.f32 0.6931472, %v1364_v59  ;;  %v866_v8 = vpop.xlane.xlu1 %865 }
 0x23e   :  { %v868_v21 = vpop.xlane.xlu0 %867  ;;  %v956_v7 = vmul.f32 0.6931472, %v1366_v20  ;;  %1375 = vlog2.f32 %v866_v8 }
 0x23f   :  { %v1000_v28 = vsub.f32 %v1750_v27, %v954_v60  ;;  %1377 = vlog2.f32 %v868_v21 }
 0x240   :  { %v1368_v62 = vpop.eup %1367  ;;  %v1001_v6 = vsub.f32 %v1765_v63, %v956_v7 }
 0x241   :  { %v1370_v10 = vpop.eup %1369  ;;  %1032 = vst [vmem:[%s1999_s2 + $0x88] sm:$0xff] %v1000_v28  ;;  %v926_v17 = vmul.f32 0.6931472, %v1368_v62  ;;  %v898_v18 = vpop.xlane.xlu1 %897 }
 0x242   :  { %v900_v19 = vpop.xlane.xlu0 %899  ;;  %1033 = vst [vmem:[%s1999_s2 + $0x90] sm:$0xff] %v1001_v6  ;;  %v928_v9 = vmul.f32 0.6931472, %v1370_v10  ;;  %1379 = vlog2.f32 %v898_v18 }
 0x243   :  { %v986_v27 = vsub.f32 %v1762_v37, %v926_v17  ;;  %1381 = vlog2.f32 %v900_v19 }
 0x244   :  { %v1372_v25 = vpop.eup %1371  ;;  %v987_v63 = vsub.f32 %v1773_v50, %v928_v9 }
 0x245   :  { %v1374_v22 = vpop.eup %1373  ;;  %1018 = vst [vmem:[%s1999_s2 + $0x18] sm:$0xff] %v986_v27  ;;  %v958_v26 = vmul.f32 0.6931472, %v1372_v25  ;;  %v870_v30 = vpop.xlane.xlu1 %869 }
 0x246   :  { %v872_v33 = vpop.xlane.xlu0 %871  ;;  %1019 = vst [vmem:[%s1999_s2 + $0x20] sm:$0xff] %v987_v63  ;;  %v960_v0 = vmul.f32 0.6931472, %v1374_v22  ;;  %1383 = vlog2.f32 %v870_v30 }
 0x247   :  { %v1002_v37 = vsub.f32 %v1770_v43, %v958_v26  ;;  %1385 = vlog2.f32 %v872_v33 }
 0x248   :  { %v1376_v42 = vpop.eup %1375  ;;  %v1003_v50 = vsub.f32 %v1781_v55, %v960_v0 }
 0x249   :  { %v1378_v35 = vpop.eup %1377  ;;  %1034 = vst [vmem:[%s1999_s2 + $0x98] sm:$0xff] %v1002_v37  ;;  %v930_v12 = vmul.f32 0.6931472, %v1376_v42  ;;  %v902_v13 = vpop.xlane.xlu1 %901 }
 0x24a   :  { %v904_v38 = vpop.xlane.xlu0 %903  ;;  %1035 = vst [vmem:[%s1999_s2 + $0xa0] sm:$0xff] %v1003_v50  ;;  %v932_v39 = vmul.f32 0.6931472, %v1378_v35  ;;  %1387 = vlog2.f32 %v902_v13 }
 0x24b   :  { %v988_v43 = vsub.f32 %v1778_v54, %v930_v12  ;;  %1389 = vlog2.f32 %v904_v38 }
 0x24c   :  { %v1380_v46 = vpop.eup %1379  ;;  %v989_v55 = vsub.f32 %v1789_v31, %v932_v39 }
 0x24d   :  { %v1382_v15 = vpop.eup %1381  ;;  %1020 = vst [vmem:[%s1999_s2 + $0x28] sm:$0xff] %v988_v43  ;;  %v962_v16 = vmul.f32 0.6931472, %v1380_v46  ;;  %v874_v51 = vpop.xlane.xlu1 %873 }
 0x24e   :  { %v876_v11 = vpop.xlane.xlu0 %875  ;;  %1021 = vst [vmem:[%s1999_s2 + $0x30] sm:$0xff] %v989_v55  ;;  %v964_v52 = vmul.f32 0.6931472, %v1382_v15  ;;  %1391 = vlog2.f32 %v874_v51 }
 0x24f   :  { %v1004_v54 = vsub.f32 %v1786_v2, %v962_v16  ;;  %1393 = vlog2.f32 %v876_v11 }
 0x250   :  { %v1384_v53 = vpop.eup %1383  ;;  %v1005_v31 = vsub.f32 %v1797_v40, %v964_v52 }
 0x251   :  { %v1386_v5 = vpop.eup %1385  ;;  %1036 = vst [vmem:[%s1999_s2 + $0xa8] sm:$0xff] %v1004_v54  ;;  %v934_v29 = vmul.f32 0.6931472, %v1384_v53  ;;  %v906_v56 = vpop.xlane.xlu1 %905 }
 0x252   :  { %v908_v59 = vpop.xlane.xlu0 %907  ;;  %1037 = vst [vmem:[%s1999_s2 + $0xb0] sm:$0xff] %v1005_v31  ;;  %v936_v20 = vmul.f32 0.6931472, %v1386_v5  ;;  %1395 = vlog2.f32 %v906_v56 }
 0x253   :  { %v990_v2 = vsub.f32 %v1794_v49, %v934_v29  ;;  %1397 = vlog2.f32 %v908_v59 }
 0x254   :  { %v1388_v60 = vpop.eup %1387  ;;  %v991_v40 = vsub.f32 %v1805_v47, %v936_v20 }
 0x255   :  { %v1390_v8 = vpop.eup %1389  ;;  %1022 = vst [vmem:[%s1999_s2 + $0x38] sm:$0xff] %v990_v2  ;;  %v966_v21 = vmul.f32 0.6931472, %v1388_v60  ;;  %v878_v7 = vpop.xlane.xlu1 %877 }
 0x256   :  { %v880_v28 = vpop.xlane.xlu0 %879  ;;  %1023 = vst [vmem:[%s1999_s2 + $0x40] sm:$0xff] %v991_v40  ;;  %v968_v62 = vmul.f32 0.6931472, %v1390_v8  ;;  %1399 = vlog2.f32 %v878_v7 }
 0x257   :  { %v1006_v49 = vsub.f32 %v1802_v34, %v966_v21  ;;  %1401 = vlog2.f32 %v880_v28 }
 0x258   :  { %v1392_v6 = vpop.eup %1391  ;;  %v1007_v47 = vsub.f32 %v1813_v57, %v968_v62 }
 0x259   :  { %v1394_v10 = vpop.eup %1393  ;;  %1038 = vst [vmem:[%s1999_s2 + $0xb8] sm:$0xff] %v1006_v49  ;;  %v938_v17 = vmul.f32 0.6931472, %v1392_v6  ;;  %v910_v18 = vpop.xlane.xlu1 %909 }
 0x25a   :  { %v912_v19 = vpop.xlane.xlu0 %911  ;;  %1039 = vst [vmem:[%s1999_s2 + $0xc0] sm:$0xff] %v1007_v47  ;;  %v940_v9 = vmul.f32 0.6931472, %v1394_v10  ;;  %1403 = vlog2.f32 %v910_v18 }
 0x25b   :  { %v992_v34 = vsub.f32 %v1810_v41, %v938_v17  ;;  %1405 = vlog2.f32 %v912_v19 }
 0x25c   :  { %v1396_v27 = vpop.eup %1395  ;;  %v993_v57 = vsub.f32 %v1821_v3, %v940_v9 }
 0x25d   :  { %v1398_v25 = vpop.eup %1397  ;;  %1024 = vst [vmem:[%s1999_s2 + $0x48] sm:$0xff] %v992_v34  ;;  %v970_v63 = vmul.f32 0.6931472, %v1396_v27  ;;  %v882_v22 = vpop.xlane.xlu1 %881 }
 0x25e   :  { %v884_v26 = vpop.xlane.xlu0 %883  ;;  %1025 = vst [vmem:[%s1999_s2 + $0x50] sm:$0xff] %v993_v57  ;;  %v972_v30 = vmul.f32 0.6931472, %v1398_v25  ;;  %1407 = vlog2.f32 %v882_v22 }
 0x25f   :  { %v1008_v41 = vsub.f32 %v1818_v24, %v970_v63  ;;  %1409 = vlog2.f32 %v884_v26 }
 0x260   :  { %v1400_v33 = vpop.eup %1399  ;;  %v1009_v3 = vsub.f32 %v1829_v14, %v972_v30 }
 0x261   :  { %v1402_v0 = vpop.eup %1401  ;;  %1040 = vst [vmem:[%s1999_s2 + $0xc8] sm:$0xff] %v1008_v41  ;;  %v942_v37 = vmul.f32 0.6931472, %v1400_v33  ;;  %v914_v42 = vpop.xlane.xlu1 %913 }
 0x262   :  { %v916_v50 = vpop.xlane.xlu0 %915  ;;  %1041 = vst [vmem:[%s1999_s2 + $0xd0] sm:$0xff] %v1009_v3  ;;  %v944_v35 = vmul.f32 0.6931472, %v1402_v0  ;;  %1411 = vlog2.f32 %v914_v42 }
 0x263   :  { %v994_v24 = vsub.f32 %v1826_v32, %v942_v37  ;;  %1413 = vlog2.f32 %v916_v50 }
 0x264   :  { %v1404_v12 = vpop.eup %1403  ;;  %v995_v14 = vsub.f32 %v1837_v23, %v944_v35 }
 0x265   :  { %v1406_v13 = vpop.eup %1405  ;;  %1026 = vst [vmem:[%s1999_s2 + $0x58] sm:$0xff] %v994_v24  ;;  %v974_v38 = vmul.f32 0.6931472, %v1404_v12  ;;  %v886_v39 = vpop.xlane.xlu1 %885 }
 0x266   :  { %1027 = vst [vmem:[%s1999_s2 + $0x60] sm:$0xff] %v995_v14  ;;  %v976_v43 = vmul.f32 0.6931472, %v1406_v13  ;;  %1415 = vlog2.f32 %v886_v39 }
 0x267   :  { %v1010_v46 = vsub.f32 %v1834_v45, %v974_v38 }
 0x268   :  { %v1408_v32 = vpop.eup %1407  ;;  %v1011_v55 = vsub.f32 %v1845_v36, %v976_v43 }
 0x269   :  { %v1410_v15 = vpop.eup %1409  ;;  %1042 = vst [vmem:[%s1999_s2 + $0xd8] sm:$0xff] %v1010_v46  ;;  %v946_v23 = vmul.f32 0.6931472, %v1408_v32  ;;  %v918_v16 = vpop.xlane.xlu1 %917 }
 0x26a   :  { %1043 = vst [vmem:[%s1999_s2 + $0xe0] sm:$0xff] %v1011_v55  ;;  %v948_v51 = vmul.f32 0.6931472, %v1410_v15  ;;  %1417 = vlog2.f32 %v918_v16 }
 0x26b   :  { %v996_v11 = vsub.f32 %v1842_v48, %v946_v23 }
 0x26c   :  { %v1412_v52 = vpop.eup %1411  ;;  %v997_v45 = vsub.f32 %v1853_v44, %v948_v51 }
 0x26d   :  { %v1414_v54 = vpop.eup %1413  ;;  %1028 = vst [vmem:[%s1999_s2 + $0x68] sm:$0xff] %v996_v11  ;;  %v978_v36 = vmul.f32 0.6931472, %v1412_v52 }
 0x26e   :  { %1029 = vst [vmem:[%s1999_s2 + $0x70] sm:$0xff] %v997_v45  ;;  %v980_v53 = vmul.f32 0.6931472, %v1414_v54 }
 0x26f   :  { %v1012_v31 = vsub.f32 %v1850_v1, %v978_v36 }
 0x270   :  { %v1416_v5 = vpop.eup %1415  ;;  %v1013_v29 = vsub.f32 %v1858_v58, %v980_v53 }
 0x271   :  { %1044 = vst [vmem:[%s1999_s2 + $0xe8] sm:$0xff] %v1012_v31  ;;  %v950_v48 = vmul.f32 0.6931472, %v1416_v5 }
 0x272   :  { %1045 = vst [vmem:[%s1999_s2 + $0xf0] sm:$0xff] %v1013_v29 }
 0x273   :  { %v998_v44 = vsub.f32 %v1861_v4, %v950_v48 }
 0x274   :  { %v1418_v56 = vpop.eup %1417 }
 0x275   :  { %1030 = vst [vmem:[%s1999_s2 + $0x78] sm:$0xff] %v998_v44  ;;  %v982_v1 = vmul.f32 0.6931472, %v1418_v56 }
 0x277   :  { %v1014_v59 = vsub.f32 %v1866_v61, %v982_v1 }
 0x279   :  { %1046 = vst [vmem:[%s1999_s2 + $0xf8] sm:$0xff] %v1014_v59 }

</bundles_post_ra>
